<compile_context>
chip_gen: v5e
topology: v5e:2x2
jax: 0.10.0
libtpu: 0.0.40
codegen_flags: <defaults>
</compile_context>

<pallas_src>
import functools
import numpy as np
import jax
import jax.numpy as jnp
from jax.experimental import pallas as pl
from jax.experimental.pallas import tpu as pltpu

D_MODEL = 32
N_HEADS = 4
HEAD_DIM = D_MODEL // N_HEADS
D_FF = 2048          # torch TransformerEncoderLayer default dim_feedforward
N_LAYERS = 5
LN_EPS = 1e-5


def _layer_norm(x, w, b):
    mu = jnp.mean(x, axis=-1, keepdims=True)
    var = jnp.mean((x - mu) ** 2, axis=-1, keepdims=True)
    return (x - mu) * jax.lax.rsqrt(var + LN_EPS) * w + b


def encoder_layer_kernel(x_ref, kpm_ref,
                         wqkv_ref, bqkv_ref, wo_ref, bo_ref,
                         ln1w_ref, ln1b_ref,
                         w1_ref, b1_ref, w2_ref, b2_ref,
                         ln2w_ref, ln2b_ref,
                         out_ref):
    l = pl.program_id(0)
    B, S = kpm_ref.shape
    BS, D = x_ref.shape

    # Layer-to-layer carry lives in the resident output block; seed from input.
    @pl.when(l == 0)
    def _():
        out_ref[...] = x_ref[...]

    x = out_ref[...]                                            # (BS, D) f32

    # ---- additive attention mask: causal (from iota) + key padding ---------
    row = jax.lax.broadcasted_iota(jnp.int32, (S, S), 0)
    col = jax.lax.broadcasted_iota(jnp.int32, (S, S), 1)
    causal = jnp.where(col > row, -jnp.inf, 0.0).astype(jnp.float32)   # (S, S)
    mask = causal[None, :, :] + kpm_ref[...][:, None, :]               # (B, S, S)

    scale = jnp.float32(1.0 / np.sqrt(HEAD_DIM))
    x_bf = x.astype(jnp.bfloat16)

    # ---- multi-head self-attention (bf16 MXU inputs, f32 accumulation) -----
    qkv = jnp.dot(x_bf, wqkv_ref[...],
                  preferred_element_type=jnp.float32) + bqkv_ref[...]  # (BS, 3D)
    q = qkv[:, :D].reshape(B, S, D)
    k = qkv[:, D:2 * D].reshape(B, S, D)
    v = qkv[:, 2 * D:].reshape(B, S, D)

    attn = None
    for h in range(N_HEADS):
        sl = slice(h * HEAD_DIM, (h + 1) * HEAD_DIM)
        qh = q[..., sl].astype(jnp.bfloat16)
        kh = k[..., sl].astype(jnp.bfloat16)
        vh = v[..., sl].astype(jnp.bfloat16)
        s = jnp.einsum('bqd,bkd->bqk', qh, kh,
                       preferred_element_type=jnp.float32) * scale + mask
        s = s - jnp.max(s, axis=-1, keepdims=True)
        p = jnp.exp(s)
        p = p / jnp.sum(p, axis=-1, keepdims=True)      # exact divide (torch parity)
        oh = jnp.einsum('bqk,bkd->bqd', p.astype(jnp.bfloat16), vh,
                        preferred_element_type=jnp.float32)             # (B, S, hd)
        # Fold this head's output straight into the out-projection (per-head
        # Wo slab indexed on the leading dim) — no concat / lane re-interleave.
        part = jnp.dot(oh.reshape(BS, HEAD_DIM).astype(jnp.bfloat16),
                       wo_ref[h], preferred_element_type=jnp.float32)
        attn = part if attn is None else attn + part
    attn = attn + bo_ref[...]

    # ---- residual + LayerNorm 1 (post-norm, torch default), f32 ------------
    x1 = _layer_norm(x + attn, ln1w_ref[...], ln1b_ref[...])

    # ---- FFN (relu) + residual + LayerNorm 2 -------------------------------
    h1 = jnp.maximum(
        jnp.dot(x1.astype(jnp.bfloat16), w1_ref[...],
                preferred_element_type=jnp.float32) + b1_ref[...], 0.0)
    ff = jnp.dot(h1.astype(jnp.bfloat16), w2_ref[...],
                 preferred_element_type=jnp.float32) + b2_ref[...]
    out_ref[...] = _layer_norm(x1 + ff, ln2w_ref[...], ln2b_ref[...])


@functools.lru_cache(maxsize=None)
def positional_embedding(seq_len, d_model):
    # positional_embedding() is not defined in the provided source; standard
    # sinusoidal embedding is assumed.  Cached -> baked in as a jit constant.
    pos = np.arange(seq_len, dtype=np.float32)[:, None]
    i = np.arange(d_model // 2, dtype=np.float32)[None, :]
    angle = pos / np.power(10000.0, 2.0 * i / d_model)
    pe = np.zeros((seq_len, d_model), np.float32)
    pe[:, 0::2] = np.sin(angle)
    pe[:, 1::2] = np.cos(angle)
    return jnp.asarray(pe)


def _wspec(*dims):
    n = len(dims)
    return pl.BlockSpec((None,) + dims, lambda l, _n=n: (l,) + (0,) * _n)


@jax.jit
def graph_decoder_forward(params, input_seq, padding_mask):
    """params: layer-stacked weights from init_params(). One fused pallas_call."""
    B, S, D = input_seq.shape
    x = (input_seq + positional_embedding(S, D)[None]).astype(jnp.float32)
    x2d = x.reshape(B * S, D)
    # torch: inf_mask = where(~padding_mask, -inf, 0)  -> True == valid token.
    keypad = jnp.where(padding_mask, 0.0, -jnp.inf).astype(jnp.float32)   # (B, S)

    (wqkv, bqkv, wo, bo, ln1w, ln1b, w1, b1, w2, b2, ln2w, ln2b) = params

    flops = N_LAYERS * (2 * B * S * D * 3 * D                 # QKV proj
                        + 4 * B * N_HEADS * S * S * HEAD_DIM  # scores + p@v
                        + 2 * B * S * D * D                   # out proj
                        + 4 * B * S * D * D_FF)               # FFN
    bytes_accessed = sum(int(np.prod(p.shape)) * p.dtype.itemsize for p in params) \
        + 2 * B * S * D * 4
    cost = pl.CostEstimate(flops=flops,
                           transcendentals=N_LAYERS * B * N_HEADS * S * S,
                           bytes_accessed=bytes_accessed)

    in_specs = [
        pl.BlockSpec((B * S, D), lambda l: (0, 0)),     # x (read at l==0)
        pl.BlockSpec((B, S), lambda l: (0, 0)),         # key-padding mask
        _wspec(D, 3 * D), _wspec(1, 3 * D),             # wqkv (bf16), bqkv
        _wspec(N_HEADS, HEAD_DIM, D), _wspec(1, D),     # wo (bf16, per head), bo
        _wspec(1, D), _wspec(1, D),                     # ln1w, ln1b
        _wspec(D, D_FF), _wspec(1, D_FF),               # w1 (bf16), b1
        _wspec(D_FF, D), _wspec(1, D),                  # w2 (bf16), b2
        _wspec(1, D), _wspec(1, D),                     # ln2w, ln2b
    ]
    out_spec = pl.BlockSpec((B * S, D), lambda l: (0, 0))   # resident carry

    out = pl.pallas_call(
        encoder_layer_kernel,
        grid=(N_LAYERS,),
        in_specs=in_specs,
        out_specs=out_spec,
        out_shape=jax.ShapeDtypeStruct((B * S, D), jnp.float32),
        compiler_params=pltpu.CompilerParams(
            dimension_semantics=("arbitrary",)),
        cost_estimate=cost,
    )(x2d, keypad, wqkv, bqkv, wo, bo, ln1w, ln1b, w1, b1, w2, b2, ln2w, ln2b)
    return out.reshape(B, S, D)


def init_params(key):
    names = ("wqkv", "bqkv", "wo", "bo", "ln1w", "ln1b",
             "w1", "b1", "w2", "b2", "ln2w", "ln2b")
    bf16_names = {"wqkv", "wo", "w1", "w2"}
    per = {n: [] for n in names}
    for layer in range(N_LAYERS):
        ks = jax.random.split(jax.random.fold_in(key, layer), 4)
        per["wqkv"].append(jax.random.normal(ks[0], (D_MODEL, 3 * D_MODEL), jnp.float32) * 0.05)
        per["bqkv"].append(jnp.zeros((1, 3 * D_MODEL), jnp.float32))
        per["wo"].append(jax.random.normal(ks[1], (D_MODEL, D_MODEL), jnp.float32) * 0.05)
        per["bo"].append(jnp.zeros((1, D_MODEL), jnp.float32))
        per["ln1w"].append(jnp.ones((1, D_MODEL), jnp.float32))
        per["ln1b"].append(jnp.zeros((1, D_MODEL), jnp.float32))
        per["w1"].append(jax.random.normal(ks[2], (D_MODEL, D_FF), jnp.float32) * 0.05)
        per["b1"].append(jnp.zeros((1, D_FF), jnp.float32))
        per["w2"].append(jax.random.normal(ks[3], (D_FF, D_MODEL), jnp.float32) * 0.02)
        per["b2"].append(jnp.zeros((1, D_MODEL), jnp.float32))
        per["ln2w"].append(jnp.ones((1, D_MODEL), jnp.float32))
        per["ln2b"].append(jnp.zeros((1, D_MODEL), jnp.float32))
    out = []
    for n in names:
        stacked = jnp.stack(per[n], axis=0)
        if n == "wo":
            # split rows head-major so the kernel can index one head's slab
            stacked = stacked.reshape(N_LAYERS, N_HEADS, HEAD_DIM, D_MODEL)
        if n in bf16_names:
            stacked = stacked.astype(jnp.bfloat16)
        out.append(stacked)
    return tuple(out)


if __name__ == "__main__":
    B, S = 2, 8
    key = jax.random.PRNGKey(0)
    k_x, k_p = jax.random.split(key)
    input_seq = jax.random.normal(k_x, (B, S, D_MODEL), jnp.float32)
    # True = valid token (matches torch module: ~padding_mask positions -> -inf).
    # All-valid here so every softmax row has at least one visible key
    # (fully-masked query rows would produce NaN in torch as well).
    padding_mask = jnp.ones((B, S), dtype=bool)

    params = init_params(k_p)
    out = graph_decoder_forward(params, input_seq, padding_mask)
    out = jax.block_until_ready(out)

    assert out.shape == (B, S, D_MODEL), out.shape
    assert bool(jnp.all(jnp.isfinite(out)))
    print("KERNEL_OK")
</pallas_src>

<mosaic_0001>
module attributes {stable_mosaic.version = 11 : i64} {
  func.func @encoder_layer_kernel(%arg0: i32, %arg1: memref<16x32xf32, #tpu.memory_space<vmem>>, %arg2: memref<2x8xf32, #tpu.memory_space<vmem>>, %arg3: memref<1x32x96xbf16, #tpu.memory_space<vmem>>, %arg4: memref<1x1x96xf32, #tpu.memory_space<vmem>>, %arg5: memref<1x4x8x32xbf16, #tpu.memory_space<vmem>>, %arg6: memref<1x1x32xf32, #tpu.memory_space<vmem>>, %arg7: memref<1x1x32xf32, #tpu.memory_space<vmem>>, %arg8: memref<1x1x32xf32, #tpu.memory_space<vmem>>, %arg9: memref<1x32x2048xbf16, #tpu.memory_space<vmem>>, %arg10: memref<1x1x2048xf32, #tpu.memory_space<vmem>>, %arg11: memref<1x2048x32xbf16, #tpu.memory_space<vmem>>, %arg12: memref<1x1x32xf32, #tpu.memory_space<vmem>>, %arg13: memref<1x1x32xf32, #tpu.memory_space<vmem>>, %arg14: memref<1x1x32xf32, #tpu.memory_space<vmem>>, %arg15: memref<16x32xf32, #tpu.memory_space<vmem>>) attributes {dimension_semantics = [#tpu.dimension_semantics<arbitrary>], iteration_bounds = array<i64: 5>, scalar_prefetch = 0 : i64, scratch_operands = 0 : i64, tpu.core_type = #tpu.core_type<tc>, window_params = [{pipeline_mode = #tpu.pipeline_mode<synchronous>, transform_indices = @transform_0, window_bounds = array<i64: 16, 32>}, {pipeline_mode = #tpu.pipeline_mode<synchronous>, transform_indices = @transform_1, window_bounds = array<i64: 2, 8>}, {transform_indices = @transform_2, window_bounds = array<i64: 1, 32, 96>}, {transform_indices = @transform_3, window_bounds = array<i64: 1, 1, 96>}, {transform_indices = @transform_4, window_bounds = array<i64: 1, 4, 8, 32>}, {transform_indices = @transform_5, window_bounds = array<i64: 1, 1, 32>}, {transform_indices = @transform_6, window_bounds = array<i64: 1, 1, 32>}, {transform_indices = @transform_7, window_bounds = array<i64: 1, 1, 32>}, {transform_indices = @transform_8, window_bounds = array<i64: 1, 32, 2048>}, {transform_indices = @transform_9, window_bounds = array<i64: 1, 1, 2048>}, {transform_indices = @transform_10, window_bounds = array<i64: 1, 2048, 32>}, {transform_indices = @transform_11, window_bounds = array<i64: 1, 1, 32>}, {transform_indices = @transform_12, window_bounds = array<i64: 1, 1, 32>}, {transform_indices = @transform_13, window_bounds = array<i64: 1, 1, 32>}, {pipeline_mode = #tpu.pipeline_mode<synchronous>, transform_indices = @transform_14, window_bounds = array<i64: 16, 32>}]} {
    %c0_i32 = arith.constant 0 : i32
    %0 = arith.cmpi eq, %arg0, %c0_i32 : i32
    %1 = arith.extui %0 : i1 to i32
    %c0_i32_0 = arith.constant 0 : i32
    %2 = arith.cmpi ne, %1, %c0_i32_0 : i32
    scf.if %2 {
      %c0_91 = arith.constant 0 : index
      %c0_92 = arith.constant 0 : index
      %214 = vector.load %arg1[%c0_91, %c0_92] : memref<16x32xf32, #tpu.memory_space<vmem>>, vector<16x32xf32>
      %c0_93 = arith.constant 0 : index
      %c0_94 = arith.constant 0 : index
      %215 = vector.load %arg15[%c0_93, %c0_94] : memref<16x32xf32, #tpu.memory_space<vmem>>, vector<16x32xf32>
      tpu.vector_store %arg15[%c0_93, %c0_94], %214 {strides = array<i32>} : memref<16x32xf32, #tpu.memory_space<vmem>>, vector<16x32xf32>,
    } else {
    }
    %c0 = arith.constant 0 : index
    %c0_1 = arith.constant 0 : index
    %3 = vector.load %arg15[%c0, %c0_1] : memref<16x32xf32, #tpu.memory_space<vmem>>, vector<16x32xf32>
    %4 = tpu.iota {dimensions = array<i32: 0>} : vector<8x8xi32>
    %5 = tpu.iota {dimensions = array<i32: 1>} : vector<8x8xi32>
    %6 = arith.cmpi sgt, %5, %4 : vector<8x8xi32>
    %cst = arith.constant 0xFF800000 : f32
    %cst_2 = arith.constant 0.000000e+00 : f32
    %7 = vector.broadcast %cst : f32 to vector<8x8xf32>
    %8 = vector.broadcast %cst_2 : f32 to vector<8x8xf32>
    %9 = arith.select %6, %7, %8 : vector<8x8xi1>, vector<8x8xf32>
    %10 = vector.shape_cast %9 : vector<8x8xf32> to vector<1x8x8xf32>
    %c0_3 = arith.constant 0 : index
    %c0_4 = arith.constant 0 : index
    %11 = vector.load %arg2[%c0_3, %c0_4] : memref<2x8xf32, #tpu.memory_space<vmem>>, vector<2x8xf32>
    %12 = vector.shape_cast %11 : vector<2x8xf32> to vector<2x1x8xf32>
    %13 = vector.broadcast %10 : vector<1x8x8xf32> to vector<2x8x8xf32>
    %14 = vector.broadcast %12 : vector<2x1x8xf32> to vector<2x8x8xf32>
    %15 = arith.addf %13, %14 : vector<2x8x8xf32>
    %16 = arith.truncf %3 : vector<16x32xf32> to vector<16x32xbf16>
    %c0_5 = arith.constant 0 : index
    %c0_6 = arith.constant 0 : index
    %c0_7 = arith.constant 0 : index
    %17 = vector.load %arg3[%c0_5, %c0_6, %c0_7] : memref<1x32x96xbf16, #tpu.memory_space<vmem>>, vector<1x32x96xbf16>
    %18 = vector.shape_cast %17 : vector<1x32x96xbf16> to vector<32x96xbf16>
    %cst_8 = arith.constant dense<0.000000e+00> : vector<16x96xf32>
    %19 = tpu.matmul %16, %18, %cst_8 {dimension_numbers = #tpu.dot_dimension_numbers<[1], [0], [0], [1], [0, 0, 1, 1], [], []>} : vector<16x32xbf16>, vector<32x96xbf16>, vector<16x96xf32> -> vector<16x96xf32>
    %c0_9 = arith.constant 0 : index
    %c0_10 = arith.constant 0 : index
    %c0_11 = arith.constant 0 : index
    %20 = vector.load %arg4[%c0_9, %c0_10, %c0_11] : memref<1x1x96xf32, #tpu.memory_space<vmem>>, vector<1x1x96xf32>
    %21 = vector.shape_cast %20 : vector<1x1x96xf32> to vector<1x96xf32>
    %22 = vector.broadcast %21 : vector<1x96xf32> to vector<16x96xf32>
    %23 = arith.addf %19, %22 : vector<16x96xf32>
    %24 = vector.extract_strided_slice %23 {offsets = [0, 0], sizes = [16, 32], strides = [1, 1]} : vector<16x96xf32> to vector<16x32xf32>
    %25 = vector.shape_cast %24 : vector<16x32xf32> to vector<2x8x32xf32>
    %26 = vector.extract_strided_slice %23 {offsets = [0, 32], sizes = [16, 32], strides = [1, 1]} : vector<16x96xf32> to vector<16x32xf32>
    %27 = vector.shape_cast %26 : vector<16x32xf32> to vector<2x8x32xf32>
    %28 = vector.extract_strided_slice %23 {offsets = [0, 64], sizes = [16, 32], strides = [1, 1]} : vector<16x96xf32> to vector<16x32xf32>
    %29 = vector.shape_cast %28 : vector<16x32xf32> to vector<2x8x32xf32>
    %30 = vector.extract_strided_slice %25 {offsets = [0, 0, 0], sizes = [2, 8, 8], strides = [1, 1, 1]} : vector<2x8x32xf32> to vector<2x8x8xf32>
    %31 = arith.truncf %30 : vector<2x8x8xf32> to vector<2x8x8xbf16>
    %32 = vector.extract_strided_slice %27 {offsets = [0, 0, 0], sizes = [2, 8, 8], strides = [1, 1, 1]} : vector<2x8x32xf32> to vector<2x8x8xf32>
    %33 = arith.truncf %32 : vector<2x8x8xf32> to vector<2x8x8xbf16>
    %34 = vector.extract_strided_slice %29 {offsets = [0, 0, 0], sizes = [2, 8, 8], strides = [1, 1, 1]} : vector<2x8x32xf32> to vector<2x8x8xf32>
    %35 = arith.truncf %34 : vector<2x8x8xf32> to vector<2x8x8xbf16>
    "tpu.trace_start"() <{level = 10 : i32, message = "bqd,bkd->bqk"}> : () -> ()
    %cst_12 = arith.constant dense<0.000000e+00> : vector<2x8x8xf32>
    %36 = tpu.matmul %31, %33, %cst_12 {dimension_numbers = #tpu.dot_dimension_numbers<[2], [2], [1], [1], [0, 0, 0, 1, 1, 1], [0], [0]>} : vector<2x8x8xbf16>, vector<2x8x8xbf16>, vector<2x8x8xf32> -> vector<2x8x8xf32>
    "tpu.trace_stop"() : () -> ()
    %cst_13 = arith.constant 0.353553385 : f32
    %37 = vector.broadcast %cst_13 : f32 to vector<2x8x8xf32>
    %38 = arith.mulf %36, %37 : vector<2x8x8xf32>
    %39 = arith.addf %38, %15 : vector<2x8x8xf32>
    %cst_14 = arith.constant dense<0xFF800000> : vector<2x8xf32>
    %40 = vector.multi_reduction <maximumf>, %39, %cst_14 [2] : vector<2x8x8xf32> to vector<2x8xf32>
    %41 = vector.shape_cast %40 : vector<2x8xf32> to vector<2x8x1xf32>
    %42 = vector.broadcast %41 : vector<2x8x1xf32> to vector<2x8x8xf32>
    %43 = arith.subf %39, %42 : vector<2x8x8xf32>
    %44 = math.exp %43 : vector<2x8x8xf32>
    %cst_15 = arith.constant dense<0.000000e+00> : vector<2x8xf32>
    %45 = vector.multi_reduction <add>, %44, %cst_15 [2] : vector<2x8x8xf32> to vector<2x8xf32>
    %46 = vector.shape_cast %45 : vector<2x8xf32> to vector<2x8x1xf32>
    %47 = vector.broadcast %46 : vector<2x8x1xf32> to vector<2x8x8xf32>
    %48 = arith.divf %44, %47 : vector<2x8x8xf32>
    %49 = arith.truncf %48 : vector<2x8x8xf32> to vector<2x8x8xbf16>
    "tpu.trace_start"() <{level = 10 : i32, message = "bqk,bkd->bqd"}> : () -> ()
    %cst_16 = arith.constant dense<0.000000e+00> : vector<2x8x8xf32>
    %50 = tpu.matmul %49, %35, %cst_16 {dimension_numbers = #tpu.dot_dimension_numbers<[2], [1], [1], [2], [0, 0, 0, 1, 1, 2], [0], [0]>} : vector<2x8x8xbf16>, vector<2x8x8xbf16>, vector<2x8x8xf32> -> vector<2x8x8xf32>
    "tpu.trace_stop"() : () -> ()
    %51 = vector.shape_cast %50 : vector<2x8x8xf32> to vector<16x8xf32>
    %52 = arith.truncf %51 : vector<16x8xf32> to vector<16x8xbf16>
    %c0_17 = arith.constant 0 : index
    %c0_18 = arith.constant 0 : index
    %c0_19 = arith.constant 0 : index
    %c0_20 = arith.constant 0 : index
    %53 = vector.load %arg5[%c0_17, %c0_18, %c0_19, %c0_20] : memref<1x4x8x32xbf16, #tpu.memory_space<vmem>>, vector<1x1x8x32xbf16>
    %54 = vector.shape_cast %53 : vector<1x1x8x32xbf16> to vector<8x32xbf16>
    %cst_21 = arith.constant dense<0.000000e+00> : vector<16x32xf32>
    %55 = tpu.matmul %52, %54, %cst_21 {dimension_numbers = #tpu.dot_dimension_numbers<[1], [0], [0], [1], [0, 0, 1, 1], [], []>} : vector<16x8xbf16>, vector<8x32xbf16>, vector<16x32xf32> -> vector<16x32xf32>
    %56 = vector.extract_strided_slice %25 {offsets = [0, 0, 8], sizes = [2, 8, 8], strides = [1, 1, 1]} : vector<2x8x32xf32> to vector<2x8x8xf32>
    %57 = arith.truncf %56 : vector<2x8x8xf32> to vector<2x8x8xbf16>
    %58 = vector.extract_strided_slice %27 {offsets = [0, 0, 8], sizes = [2, 8, 8], strides = [1, 1, 1]} : vector<2x8x32xf32> to vector<2x8x8xf32>
    %59 = arith.truncf %58 : vector<2x8x8xf32> to vector<2x8x8xbf16>
    %60 = vector.extract_strided_slice %29 {offsets = [0, 0, 8], sizes = [2, 8, 8], strides = [1, 1, 1]} : vector<2x8x32xf32> to vector<2x8x8xf32>
    %61 = arith.truncf %60 : vector<2x8x8xf32> to vector<2x8x8xbf16>
    "tpu.trace_start"() <{level = 10 : i32, message = "bqd,bkd->bqk"}> : () -> ()
    %cst_22 = arith.constant dense<0.000000e+00> : vector<2x8x8xf32>
    %62 = tpu.matmul %57, %59, %cst_22 {dimension_numbers = #tpu.dot_dimension_numbers<[2], [2], [1], [1], [0, 0, 0, 1, 1, 1], [0], [0]>} : vector<2x8x8xbf16>, vector<2x8x8xbf16>, vector<2x8x8xf32> -> vector<2x8x8xf32>
    "tpu.trace_stop"() : () -> ()
    %cst_23 = arith.constant 0.353553385 : f32
    %63 = vector.broadcast %cst_23 : f32 to vector<2x8x8xf32>
    %64 = arith.mulf %62, %63 : vector<2x8x8xf32>
    %65 = arith.addf %64, %15 : vector<2x8x8xf32>
    %cst_24 = arith.constant dense<0xFF800000> : vector<2x8xf32>
    %66 = vector.multi_reduction <maximumf>, %65, %cst_24 [2] : vector<2x8x8xf32> to vector<2x8xf32>
    %67 = vector.shape_cast %66 : vector<2x8xf32> to vector<2x8x1xf32>
    %68 = vector.broadcast %67 : vector<2x8x1xf32> to vector<2x8x8xf32>
    %69 = arith.subf %65, %68 : vector<2x8x8xf32>
    %70 = math.exp %69 : vector<2x8x8xf32>
    %cst_25 = arith.constant dense<0.000000e+00> : vector<2x8xf32>
    %71 = vector.multi_reduction <add>, %70, %cst_25 [2] : vector<2x8x8xf32> to vector<2x8xf32>
    %72 = vector.shape_cast %71 : vector<2x8xf32> to vector<2x8x1xf32>
    %73 = vector.broadcast %72 : vector<2x8x1xf32> to vector<2x8x8xf32>
    %74 = arith.divf %70, %73 : vector<2x8x8xf32>
    %75 = arith.truncf %74 : vector<2x8x8xf32> to vector<2x8x8xbf16>
    "tpu.trace_start"() <{level = 10 : i32, message = "bqk,bkd->bqd"}> : () -> ()
    %cst_26 = arith.constant dense<0.000000e+00> : vector<2x8x8xf32>
    %76 = tpu.matmul %75, %61, %cst_26 {dimension_numbers = #tpu.dot_dimension_numbers<[2], [1], [1], [2], [0, 0, 0, 1, 1, 2], [0], [0]>} : vector<2x8x8xbf16>, vector<2x8x8xbf16>, vector<2x8x8xf32> -> vector<2x8x8xf32>
    "tpu.trace_stop"() : () -> ()
    %77 = vector.shape_cast %76 : vector<2x8x8xf32> to vector<16x8xf32>
    %78 = arith.truncf %77 : vector<16x8xf32> to vector<16x8xbf16>
    %c0_27 = arith.constant 0 : index
    %c1 = arith.constant 1 : index
    %c0_28 = arith.constant 0 : index
    %c0_29 = arith.constant 0 : index
    %79 = vector.load %arg5[%c0_27, %c1, %c0_28, %c0_29] : memref<1x4x8x32xbf16, #tpu.memory_space<vmem>>, vector<1x1x8x32xbf16>
    %80 = vector.shape_cast %79 : vector<1x1x8x32xbf16> to vector<8x32xbf16>
    %cst_30 = arith.constant dense<0.000000e+00> : vector<16x32xf32>
    %81 = tpu.matmul %78, %80, %cst_30 {dimension_numbers = #tpu.dot_dimension_numbers<[1], [0], [0], [1], [0, 0, 1, 1], [], []>} : vector<16x8xbf16>, vector<8x32xbf16>, vector<16x32xf32> -> vector<16x32xf32>
    %82 = arith.addf %55, %81 : vector<16x32xf32>
    %83 = vector.extract_strided_slice %25 {offsets = [0, 0, 16], sizes = [2, 8, 8], strides = [1, 1, 1]} : vector<2x8x32xf32> to vector<2x8x8xf32>
    %84 = arith.truncf %83 : vector<2x8x8xf32> to vector<2x8x8xbf16>
    %85 = vector.extract_strided_slice %27 {offsets = [0, 0, 16], sizes = [2, 8, 8], strides = [1, 1, 1]} : vector<2x8x32xf32> to vector<2x8x8xf32>
    %86 = arith.truncf %85 : vector<2x8x8xf32> to vector<2x8x8xbf16>
    %87 = vector.extract_strided_slice %29 {offsets = [0, 0, 16], sizes = [2, 8, 8], strides = [1, 1, 1]} : vector<2x8x32xf32> to vector<2x8x8xf32>
    %88 = arith.truncf %87 : vector<2x8x8xf32> to vector<2x8x8xbf16>
    "tpu.trace_start"() <{level = 10 : i32, message = "bqd,bkd->bqk"}> : () -> ()
    %cst_31 = arith.constant dense<0.000000e+00> : vector<2x8x8xf32>
    %89 = tpu.matmul %84, %86, %cst_31 {dimension_numbers = #tpu.dot_dimension_numbers<[2], [2], [1], [1], [0, 0, 0, 1, 1, 1], [0], [0]>} : vector<2x8x8xbf16>, vector<2x8x8xbf16>, vector<2x8x8xf32> -> vector<2x8x8xf32>
    "tpu.trace_stop"() : () -> ()
    %cst_32 = arith.constant 0.353553385 : f32
    %90 = vector.broadcast %cst_32 : f32 to vector<2x8x8xf32>
    %91 = arith.mulf %89, %90 : vector<2x8x8xf32>
    %92 = arith.addf %91, %15 : vector<2x8x8xf32>
    %cst_33 = arith.constant dense<0xFF800000> : vector<2x8xf32>
    %93 = vector.multi_reduction <maximumf>, %92, %cst_33 [2] : vector<2x8x8xf32> to vector<2x8xf32>
    %94 = vector.shape_cast %93 : vector<2x8xf32> to vector<2x8x1xf32>
    %95 = vector.broadcast %94 : vector<2x8x1xf32> to vector<2x8x8xf32>
    %96 = arith.subf %92, %95 : vector<2x8x8xf32>
    %97 = math.exp %96 : vector<2x8x8xf32>
    %cst_34 = arith.constant dense<0.000000e+00> : vector<2x8xf32>
    %98 = vector.multi_reduction <add>, %97, %cst_34 [2] : vector<2x8x8xf32> to vector<2x8xf32>
    %99 = vector.shape_cast %98 : vector<2x8xf32> to vector<2x8x1xf32>
    %100 = vector.broadcast %99 : vector<2x8x1xf32> to vector<2x8x8xf32>
    %101 = arith.divf %97, %100 : vector<2x8x8xf32>
    %102 = arith.truncf %101 : vector<2x8x8xf32> to vector<2x8x8xbf16>
    "tpu.trace_start"() <{level = 10 : i32, message = "bqk,bkd->bqd"}> : () -> ()
    %cst_35 = arith.constant dense<0.000000e+00> : vector<2x8x8xf32>
    %103 = tpu.matmul %102, %88, %cst_35 {dimension_numbers = #tpu.dot_dimension_numbers<[2], [1], [1], [2], [0, 0, 0, 1, 1, 2], [0], [0]>} : vector<2x8x8xbf16>, vector<2x8x8xbf16>, vector<2x8x8xf32> -> vector<2x8x8xf32>
    "tpu.trace_stop"() : () -> ()
    %104 = vector.shape_cast %103 : vector<2x8x8xf32> to vector<16x8xf32>
    %105 = arith.truncf %104 : vector<16x8xf32> to vector<16x8xbf16>
    %c0_36 = arith.constant 0 : index
    %c2 = arith.constant 2 : index
    %c0_37 = arith.constant 0 : index
    %c0_38 = arith.constant 0 : index
    %106 = vector.load %arg5[%c0_36, %c2, %c0_37, %c0_38] : memref<1x4x8x32xbf16, #tpu.memory_space<vmem>>, vector<1x1x8x32xbf16>
    %107 = vector.shape_cast %106 : vector<1x1x8x32xbf16> to vector<8x32xbf16>
    %cst_39 = arith.constant dense<0.000000e+00> : vector<16x32xf32>
    %108 = tpu.matmul %105, %107, %cst_39 {dimension_numbers = #tpu.dot_dimension_numbers<[1], [0], [0], [1], [0, 0, 1, 1], [], []>} : vector<16x8xbf16>, vector<8x32xbf16>, vector<16x32xf32> -> vector<16x32xf32>
    %109 = arith.addf %82, %108 : vector<16x32xf32>
    %110 = vector.extract_strided_slice %25 {offsets = [0, 0, 24], sizes = [2, 8, 8], strides = [1, 1, 1]} : vector<2x8x32xf32> to vector<2x8x8xf32>
    %111 = arith.truncf %110 : vector<2x8x8xf32> to vector<2x8x8xbf16>
    %112 = vector.extract_strided_slice %27 {offsets = [0, 0, 24], sizes = [2, 8, 8], strides = [1, 1, 1]} : vector<2x8x32xf32> to vector<2x8x8xf32>
    %113 = arith.truncf %112 : vector<2x8x8xf32> to vector<2x8x8xbf16>
    %114 = vector.extract_strided_slice %29 {offsets = [0, 0, 24], sizes = [2, 8, 8], strides = [1, 1, 1]} : vector<2x8x32xf32> to vector<2x8x8xf32>
    %115 = arith.truncf %114 : vector<2x8x8xf32> to vector<2x8x8xbf16>
    "tpu.trace_start"() <{level = 10 : i32, message = "bqd,bkd->bqk"}> : () -> ()
    %cst_40 = arith.constant dense<0.000000e+00> : vector<2x8x8xf32>
    %116 = tpu.matmul %111, %113, %cst_40 {dimension_numbers = #tpu.dot_dimension_numbers<[2], [2], [1], [1], [0, 0, 0, 1, 1, 1], [0], [0]>} : vector<2x8x8xbf16>, vector<2x8x8xbf16>, vector<2x8x8xf32> -> vector<2x8x8xf32>
    "tpu.trace_stop"() : () -> ()
    %cst_41 = arith.constant 0.353553385 : f32
    %117 = vector.broadcast %cst_41 : f32 to vector<2x8x8xf32>
    %118 = arith.mulf %116, %117 : vector<2x8x8xf32>
    %119 = arith.addf %118, %15 : vector<2x8x8xf32>
    %cst_42 = arith.constant dense<0xFF800000> : vector<2x8xf32>
    %120 = vector.multi_reduction <maximumf>, %119, %cst_42 [2] : vector<2x8x8xf32> to vector<2x8xf32>
    %121 = vector.shape_cast %120 : vector<2x8xf32> to vector<2x8x1xf32>
    %122 = vector.broadcast %121 : vector<2x8x1xf32> to vector<2x8x8xf32>
    %123 = arith.subf %119, %122 : vector<2x8x8xf32>
    %124 = math.exp %123 : vector<2x8x8xf32>
    %cst_43 = arith.constant dense<0.000000e+00> : vector<2x8xf32>
    %125 = vector.multi_reduction <add>, %124, %cst_43 [2] : vector<2x8x8xf32> to vector<2x8xf32>
    %126 = vector.shape_cast %125 : vector<2x8xf32> to vector<2x8x1xf32>
    %127 = vector.broadcast %126 : vector<2x8x1xf32> to vector<2x8x8xf32>
    %128 = arith.divf %124, %127 : vector<2x8x8xf32>
    %129 = arith.truncf %128 : vector<2x8x8xf32> to vector<2x8x8xbf16>
    "tpu.trace_start"() <{level = 10 : i32, message = "bqk,bkd->bqd"}> : () -> ()
    %cst_44 = arith.constant dense<0.000000e+00> : vector<2x8x8xf32>
    %130 = tpu.matmul %129, %115, %cst_44 {dimension_numbers = #tpu.dot_dimension_numbers<[2], [1], [1], [2], [0, 0, 0, 1, 1, 2], [0], [0]>} : vector<2x8x8xbf16>, vector<2x8x8xbf16>, vector<2x8x8xf32> -> vector<2x8x8xf32>
    "tpu.trace_stop"() : () -> ()
    %131 = vector.shape_cast %130 : vector<2x8x8xf32> to vector<16x8xf32>
    %132 = arith.truncf %131 : vector<16x8xf32> to vector<16x8xbf16>
    %c0_45 = arith.constant 0 : index
    %c3 = arith.constant 3 : index
    %c0_46 = arith.constant 0 : index
    %c0_47 = arith.constant 0 : index
    %133 = vector.load %arg5[%c0_45, %c3, %c0_46, %c0_47] : memref<1x4x8x32xbf16, #tpu.memory_space<vmem>>, vector<1x1x8x32xbf16>
    %134 = vector.shape_cast %133 : vector<1x1x8x32xbf16> to vector<8x32xbf16>
    %cst_48 = arith.constant dense<0.000000e+00> : vector<16x32xf32>
    %135 = tpu.matmul %132, %134, %cst_48 {dimension_numbers = #tpu.dot_dimension_numbers<[1], [0], [0], [1], [0, 0, 1, 1], [], []>} : vector<16x8xbf16>, vector<8x32xbf16>, vector<16x32xf32> -> vector<16x32xf32>
    %136 = arith.addf %109, %135 : vector<16x32xf32>
    %c0_49 = arith.constant 0 : index
    %c0_50 = arith.constant 0 : index
    %c0_51 = arith.constant 0 : index
    %137 = vector.load %arg6[%c0_49, %c0_50, %c0_51] : memref<1x1x32xf32, #tpu.memory_space<vmem>>, vector<1x1x32xf32>
    %138 = vector.shape_cast %137 : vector<1x1x32xf32> to vector<1x32xf32>
    %139 = vector.broadcast %138 : vector<1x32xf32> to vector<16x32xf32>
    %140 = arith.addf %136, %139 : vector<16x32xf32>
    %141 = arith.addf %3, %140 : vector<16x32xf32>
    %c0_52 = arith.constant 0 : index
    %c0_53 = arith.constant 0 : index
    %c0_54 = arith.constant 0 : index
    %142 = vector.load %arg7[%c0_52, %c0_53, %c0_54] : memref<1x1x32xf32, #tpu.memory_space<vmem>>, vector<1x1x32xf32>
    %143 = vector.shape_cast %142 : vector<1x1x32xf32> to vector<1x32xf32>
    %c0_55 = arith.constant 0 : index
    %c0_56 = arith.constant 0 : index
    %c0_57 = arith.constant 0 : index
    %144 = vector.load %arg8[%c0_55, %c0_56, %c0_57] : memref<1x1x32xf32, #tpu.memory_space<vmem>>, vector<1x1x32xf32>
    %145 = vector.shape_cast %144 : vector<1x1x32xf32> to vector<1x32xf32>
    %cst_58 = arith.constant dense<0.000000e+00> : vector<16xf32>
    %146 = vector.multi_reduction <add>, %141, %cst_58 [1] : vector<16x32xf32> to vector<16xf32>
    %147 = vector.shape_cast %146 : vector<16xf32> to vector<16x1xf32>
    %cst_59 = arith.constant 3.200000e+01 : f32
    %148 = vector.broadcast %cst_59 : f32 to vector<16x1xf32>
    %149 = arith.divf %147, %148 : vector<16x1xf32>
    %150 = vector.broadcast %149 : vector<16x1xf32> to vector<16x32xf32>
    %151 = arith.subf %141, %150 : vector<16x32xf32>
    %152 = arith.mulf %151, %151 : vector<16x32xf32>
    %cst_60 = arith.constant dense<0.000000e+00> : vector<16xf32>
    %153 = vector.multi_reduction <add>, %152, %cst_60 [1] : vector<16x32xf32> to vector<16xf32>
    %154 = vector.shape_cast %153 : vector<16xf32> to vector<16x1xf32>
    %cst_61 = arith.constant 3.200000e+01 : f32
    %155 = vector.broadcast %cst_61 : f32 to vector<16x1xf32>
    %156 = arith.divf %154, %155 : vector<16x1xf32>
    %157 = vector.broadcast %149 : vector<16x1xf32> to vector<16x32xf32>
    %158 = arith.subf %141, %157 : vector<16x32xf32>
    %cst_62 = arith.constant 9.99999974E-6 : f32
    %159 = vector.broadcast %cst_62 : f32 to vector<16x1xf32>
    %160 = arith.addf %156, %159 : vector<16x1xf32>
    %161 = math.rsqrt %160 : vector<16x1xf32>
    %162 = vector.broadcast %161 : vector<16x1xf32> to vector<16x32xf32>
    %163 = arith.mulf %158, %162 : vector<16x32xf32>
    %164 = vector.broadcast %143 : vector<1x32xf32> to vector<16x32xf32>
    %165 = arith.mulf %163, %164 : vector<16x32xf32>
    %166 = vector.broadcast %145 : vector<1x32xf32> to vector<16x32xf32>
    %167 = arith.addf %165, %166 : vector<16x32xf32>
    %168 = arith.truncf %167 : vector<16x32xf32> to vector<16x32xbf16>
    %c0_63 = arith.constant 0 : index
    %c0_64 = arith.constant 0 : index
    %c0_65 = arith.constant 0 : index
    %169 = vector.load %arg9[%c0_63, %c0_64, %c0_65] : memref<1x32x2048xbf16, #tpu.memory_space<vmem>>, vector<1x32x2048xbf16>
    %170 = vector.shape_cast %169 : vector<1x32x2048xbf16> to vector<32x2048xbf16>
    %cst_66 = arith.constant dense<0.000000e+00> : vector<16x2048xf32>
    %171 = tpu.matmul %168, %170, %cst_66 {dimension_numbers = #tpu.dot_dimension_numbers<[1], [0], [0], [1], [0, 0, 1, 1], [], []>} : vector<16x32xbf16>, vector<32x2048xbf16>, vector<16x2048xf32> -> vector<16x2048xf32>
    %c0_67 = arith.constant 0 : index
    %c0_68 = arith.constant 0 : index
    %c0_69 = arith.constant 0 : index
    %172 = vector.load %arg10[%c0_67, %c0_68, %c0_69] : memref<1x1x2048xf32, #tpu.memory_space<vmem>>, vector<1x1x2048xf32>
    %173 = vector.shape_cast %172 : vector<1x1x2048xf32> to vector<1x2048xf32>
    %174 = vector.broadcast %173 : vector<1x2048xf32> to vector<16x2048xf32>
    %175 = arith.addf %171, %174 : vector<16x2048xf32>
    %cst_70 = arith.constant 0.000000e+00 : f32
    %176 = vector.broadcast %cst_70 : f32 to vector<16x2048xf32>
    %177 = arith.maximumf %175, %176 : vector<16x2048xf32>
    %178 = arith.truncf %177 : vector<16x2048xf32> to vector<16x2048xbf16>
    %c0_71 = arith.constant 0 : index
    %c0_72 = arith.constant 0 : index
    %c0_73 = arith.constant 0 : index
    %179 = vector.load %arg11[%c0_71, %c0_72, %c0_73] : memref<1x2048x32xbf16, #tpu.memory_space<vmem>>, vector<1x2048x32xbf16>
    %180 = vector.shape_cast %179 : vector<1x2048x32xbf16> to vector<2048x32xbf16>
    %cst_74 = arith.constant dense<0.000000e+00> : vector<16x32xf32>
    %181 = tpu.matmul %178, %180, %cst_74 {dimension_numbers = #tpu.dot_dimension_numbers<[1], [0], [0], [1], [0, 0, 1, 1], [], []>} : vector<16x2048xbf16>, vector<2048x32xbf16>, vector<16x32xf32> -> vector<16x32xf32>
    %c0_75 = arith.constant 0 : index
    %c0_76 = arith.constant 0 : index
    %c0_77 = arith.constant 0 : index
    %182 = vector.load %arg12[%c0_75, %c0_76, %c0_77] : memref<1x1x32xf32, #tpu.memory_space<vmem>>, vector<1x1x32xf32>
    %183 = vector.shape_cast %182 : vector<1x1x32xf32> to vector<1x32xf32>
    %184 = vector.broadcast %183 : vector<1x32xf32> to vector<16x32xf32>
    %185 = arith.addf %181, %184 : vector<16x32xf32>
    %186 = arith.addf %167, %185 : vector<16x32xf32>
    %c0_78 = arith.constant 0 : index
    %c0_79 = arith.constant 0 : index
    %c0_80 = arith.constant 0 : index
    %187 = vector.load %arg13[%c0_78, %c0_79, %c0_80] : memref<1x1x32xf32, #tpu.memory_space<vmem>>, vector<1x1x32xf32>
    %188 = vector.shape_cast %187 : vector<1x1x32xf32> to vector<1x32xf32>
    %c0_81 = arith.constant 0 : index
    %c0_82 = arith.constant 0 : index
    %c0_83 = arith.constant 0 : index
    %189 = vector.load %arg14[%c0_81, %c0_82, %c0_83] : memref<1x1x32xf32, #tpu.memory_space<vmem>>, vector<1x1x32xf32>
    %190 = vector.shape_cast %189 : vector<1x1x32xf32> to vector<1x32xf32>
    %cst_84 = arith.constant dense<0.000000e+00> : vector<16xf32>
    %191 = vector.multi_reduction <add>, %186, %cst_84 [1] : vector<16x32xf32> to vector<16xf32>
    %192 = vector.shape_cast %191 : vector<16xf32> to vector<16x1xf32>
    %cst_85 = arith.constant 3.200000e+01 : f32
    %193 = vector.broadcast %cst_85 : f32 to vector<16x1xf32>
    %194 = arith.divf %192, %193 : vector<16x1xf32>
    %195 = vector.broadcast %194 : vector<16x1xf32> to vector<16x32xf32>
    %196 = arith.subf %186, %195 : vector<16x32xf32>
    %197 = arith.mulf %196, %196 : vector<16x32xf32>
    %cst_86 = arith.constant dense<0.000000e+00> : vector<16xf32>
    %198 = vector.multi_reduction <add>, %197, %cst_86 [1] : vector<16x32xf32> to vector<16xf32>
    %199 = vector.shape_cast %198 : vector<16xf32> to vector<16x1xf32>
    %cst_87 = arith.constant 3.200000e+01 : f32
    %200 = vector.broadcast %cst_87 : f32 to vector<16x1xf32>
    %201 = arith.divf %199, %200 : vector<16x1xf32>
    %202 = vector.broadcast %194 : vector<16x1xf32> to vector<16x32xf32>
    %203 = arith.subf %186, %202 : vector<16x32xf32>
    %cst_88 = arith.constant 9.99999974E-6 : f32
    %204 = vector.broadcast %cst_88 : f32 to vector<16x1xf32>
    %205 = arith.addf %201, %204 : vector<16x1xf32>
    %206 = math.rsqrt %205 : vector<16x1xf32>
    %207 = vector.broadcast %206 : vector<16x1xf32> to vector<16x32xf32>
    %208 = arith.mulf %203, %207 : vector<16x32xf32>
    %209 = vector.broadcast %188 : vector<1x32xf32> to vector<16x32xf32>
    %210 = arith.mulf %208, %209 : vector<16x32xf32>
    %211 = vector.broadcast %190 : vector<1x32xf32> to vector<16x32xf32>
    %212 = arith.addf %210, %211 : vector<16x32xf32>
    %c0_89 = arith.constant 0 : index
    %c0_90 = arith.constant 0 : index
    %213 = vector.load %arg15[%c0_89, %c0_90] : memref<16x32xf32, #tpu.memory_space<vmem>>, vector<16x32xf32>
    tpu.vector_store %arg15[%c0_89, %c0_90], %212 {strides = array<i32>} : memref<16x32xf32, #tpu.memory_space<vmem>>, vector<16x32xf32>,
    return
  }
  func.func @transform_0(%arg0: i32) -> (i32, i32) {
    %c0_i32 = arith.constant 0 : i32
    %c0_i32_0 = arith.constant 0 : i32
    %c0_i32_1 = arith.constant 0 : i32
    return %c0_i32, %c0_i32_0 : i32, i32
  }
  func.func @transform_1(%arg0: i32) -> (i32, i32) {
    %c0_i32 = arith.constant 0 : i32
    %c0_i32_0 = arith.constant 0 : i32
    %c0_i32_1 = arith.constant 0 : i32
    return %c0_i32, %c0_i32_0 : i32, i32
  }
  func.func @transform_2(%arg0: i32) -> (i32, i32, i32) {
    %c0_i32 = arith.constant 0 : i32
    %c0_i32_0 = arith.constant 0 : i32
    %c0_i32_1 = arith.constant 0 : i32
    return %arg0, %c0_i32, %c0_i32_0 : i32, i32, i32
  }
  func.func @transform_3(%arg0: i32) -> (i32, i32, i32) {
    %c0_i32 = arith.constant 0 : i32
    %c0_i32_0 = arith.constant 0 : i32
    %c0_i32_1 = arith.constant 0 : i32
    return %arg0, %c0_i32, %c0_i32_0 : i32, i32, i32
  }
  func.func @transform_4(%arg0: i32) -> (i32, i32, i32, i32) {
    %c0_i32 = arith.constant 0 : i32
    %c0_i32_0 = arith.constant 0 : i32
    %c0_i32_1 = arith.constant 0 : i32
    %c0_i32_2 = arith.constant 0 : i32
    return %arg0, %c0_i32, %c0_i32_0, %c0_i32_1 : i32, i32, i32, i32
  }
  func.func @transform_5(%arg0: i32) -> (i32, i32, i32) {
    %c0_i32 = arith.constant 0 : i32
    %c0_i32_0 = arith.constant 0 : i32
    %c0_i32_1 = arith.constant 0 : i32
    return %arg0, %c0_i32, %c0_i32_0 : i32, i32, i32
  }
  func.func @transform_6(%arg0: i32) -> (i32, i32, i32) {
    %c0_i32 = arith.constant 0 : i32
    %c0_i32_0 = arith.constant 0 : i32
    %c0_i32_1 = arith.constant 0 : i32
    return %arg0, %c0_i32, %c0_i32_0 : i32, i32, i32
  }
  func.func @transform_7(%arg0: i32) -> (i32, i32, i32) {
    %c0_i32 = arith.constant 0 : i32
    %c0_i32_0 = arith.constant 0 : i32
    %c0_i32_1 = arith.constant 0 : i32
    return %arg0, %c0_i32, %c0_i32_0 : i32, i32, i32
  }
  func.func @transform_8(%arg0: i32) -> (i32, i32, i32) {
    %c0_i32 = arith.constant 0 : i32
    %c0_i32_0 = arith.constant 0 : i32
    %c0_i32_1 = arith.constant 0 : i32
    return %arg0, %c0_i32, %c0_i32_0 : i32, i32, i32
  }
  func.func @transform_9(%arg0: i32) -> (i32, i32, i32) {
    %c0_i32 = arith.constant 0 : i32
    %c0_i32_0 = arith.constant 0 : i32
    %c0_i32_1 = arith.constant 0 : i32
    return %arg0, %c0_i32, %c0_i32_0 : i32, i32, i32
  }
  func.func @transform_10(%arg0: i32) -> (i32, i32, i32) {
    %c0_i32 = arith.constant 0 : i32
    %c0_i32_0 = arith.constant 0 : i32
    %c0_i32_1 = arith.constant 0 : i32
    return %arg0, %c0_i32, %c0_i32_0 : i32, i32, i32
  }
  func.func @transform_11(%arg0: i32) -> (i32, i32, i32) {
    %c0_i32 = arith.constant 0 : i32
    %c0_i32_0 = arith.constant 0 : i32
    %c0_i32_1 = arith.constant 0 : i32
    return %arg0, %c0_i32, %c0_i32_0 : i32, i32, i32
  }
  func.func @transform_12(%arg0: i32) -> (i32, i32, i32) {
    %c0_i32 = arith.constant 0 : i32
    %c0_i32_0 = arith.constant 0 : i32
    %c0_i32_1 = arith.constant 0 : i32
    return %arg0, %c0_i32, %c0_i32_0 : i32, i32, i32
  }
  func.func @transform_13(%arg0: i32) -> (i32, i32, i32) {
    %c0_i32 = arith.constant 0 : i32
    %c0_i32_0 = arith.constant 0 : i32
    %c0_i32_1 = arith.constant 0 : i32
    return %arg0, %c0_i32, %c0_i32_0 : i32, i32, i32
  }
  func.func @transform_14(%arg0: i32) -> (i32, i32) {
    %c0_i32 = arith.constant 0 : i32
    %c0_i32_0 = arith.constant 0 : i32
    %c0_i32_1 = arith.constant 0 : i32
    return %c0_i32, %c0_i32_0 : i32, i32
  }
}

</mosaic_0001>

<bundles_post_ra>
// kernel: graph_decoder_forward.1
= control target key start
LH: loop header
LB: loop body
LE: loop exit
PB: predicated region body
PF: predicated region fallthrough
CT: control target
= control target key end

     0   :  { %s5041_s0 = inlined_call_operand.vmem [shape: f32[16,32], index: 0, kind: input, shape index: {}]   ;;  %s5042_s1 = inlined_call_operand.vmem [shape: f32[2,8], index: 1, kind: input, shape index: {}]   ;;  %s5043_s2 = inlined_call_operand.vmem [shape: bf16[5,32,96], index: 2, kind: input, shape index: {}]   ;;  %s5044_s3 = inlined_call_operand.vmem [shape: f32[5,1,96], index: 3, kind: input, shape index: {}]   ;;  %s5045_s4 = inlined_call_operand.vmem [shape: bf16[5,4,8,32], index: 4, kind: input, shape index: {}]   ;;  %s5046_s5 = inlined_call_operand.vmem [shape: f32[5,1,32], index: 5, kind: input, shape index: {}]   ;;  %s5047_s6 = inlined_call_operand.vmem [shape: f32[5,1,32], index: 6, kind: input, shape index: {}]   ;;  %s5048_s7 = inlined_call_operand.vmem [shape: f32[5,1,32], index: 7, kind: input, shape index: {}]   ;;  %s5049_s8 = inlined_call_operand.vmem [shape: bf16[5,32,2048], index: 8, kind: input, shape index: {}]   ;;  %s5050_s9 = inlined_call_operand.vmem [shape: f32[5,1,2048], index: 9, kind: input, shape index: {}]   ;;  %s5051_s10 = inlined_call_operand.vmem [shape: bf16[5,2048,32], index: 10, kind: input, shape index: {}]   ;;  %s5052_s11 = inlined_call_operand.vmem [shape: f32[5,1,32], index: 11, kind: input, shape index: {}]   ;;  %s5053_s12 = inlined_call_operand.vmem [shape: f32[5,1,32], index: 12, kind: input, shape index: {}]   ;;  %s5054_s13 = inlined_call_operand.vmem [shape: f32[5,1,32], index: 13, kind: input, shape index: {}]   ;;  %s5055_s14 = inlined_call_operand.hbm [shape: f32[16,32], index: 14, kind: output, shape index: {}]  }
   0x1   :  { %5058 = sst [smem:[#allocation6_spill]] %s5041_s0 }
   0x2   :  { %5059 = sst [smem:[#allocation7_spill]] %s5042_s1 }
   0x3   :  { %5060 = sst [smem:[#allocation8_spill]] %s5043_s2 }
   0x4   :  { %5061 = sst [smem:[#allocation9_spill]] %s5045_s4 }
   0x5   :  { %5062 = sst [smem:[#allocation10_spill]] %s5055_s14 }
   0x6   :  { %19 = vsyncpa [#allocation3], 0  ;;  %s4494_s29 = smov 0  }
   0x7 LB: > { %5063 = sst [smem:[#allocation5_spill]] %s4401_s29  ;;  %s4500_s30 = sadd.s32 4294967295, %s4401_s29   ;;  %s4401_s29 = sphi %s4494_s29, %s25_s29  }
   0x8   : > { %p3415_p0 = scmp.ge.s32.totalorder %s4401_s29, 1  ;;  %p503_p1 = scmp.lt.s32.totalorder %s4401_s29, 6 }
   0xa   : > { %p504_p2 = pnand %p3415_p0, %p503_p1 }
   0xb   : > { %p584_p3 = scmp.lt.s32.totalorder (!%p504_p2), %s4500_s30, 4  ;;  %s5064_s2 = sld [smem:[#allocation8_spill]] (!%p504_p2) }
   0xc   : > { %507 = sbr.rel (%p504_p2) target bundleno = 2704 (0xa90), region = 76  ;;  %s5065_s4 = sld [smem:[#allocation9_spill]] (!%p504_p2) }
   0xd   : > { %p3425_p4 = scmp.ne.s32.totalorder (!%p504_p2), %s4500_s30, 0 }
  0x11   : > { %s4506_s15 = scalar_select %p584_p3, %s4500_s30, 4 }
  0x12   : > { %s5066_s28 = sld [smem:[#allocation6_spill]] (!%p3425_p4) }
  0x13   : > { %s4118_s16 = sshll.u32 %s4506_s15, 4  ;;  %s4120_s19 = sshll.u32 %s4506_s15, 8 }
  0x14   : > { %s588_s22 = scalar_lea.vmem %s5064_s2, %s4118_s16  ;;  %s4519_s25 = scalar_lea.vmem %s5065_s4, %s4118_s16 }
  0x15   : > { %s4537_s2 = scalar_lea.vmem %s5049_s8, %s4120_s19  ;;  %s4542_s4 = scalar_lea.vmem %s5050_s9, %s4118_s16 }
  0x16   : > { %s4121_s26 = sshll.u32 %s4506_s15, 10  ;;  %s622_s14 = scalar_lea.vmem %s5052_s11, %s4506_s15 }
  0x17   : > { %s4552_s0 = scalar_lea.vmem %s5051_s10, %s4121_s26  ;;  %s625_s19 = scalar_lea.vmem %s5053_s12, %s4506_s15 }
  0x18   : > { %s628_s23 = scalar_lea.vmem %s5054_s13, %s4506_s15  ;;  %633 = sbr.rel (%p3425_p4) target bundleno = 32 (0x20), region = 80 }
  0x1d   : > { %v634_v0 = vld [vmem:[%s5066_s28] sm:$0xff]  ;;  %vm636_vm0 = vcmask 261120   ;;  %v635_v1 = vld [vmem:[%s5066_s28 + $0x8] sm:$0xff] }
  0x1e   : > { %637 = vst.msk [vmem:[#allocation2] sm:$0xff] %vm636_vm0, %v634_v0 }
  0x1f   : > { %638 = vst.msk [vmem:[#allocation2 + $0x8] sm:$0xff] %vm636_vm0, %v635_v1 }
  0x20 PF: > { %v4123_v2 = vld [vmem:[%s588_s22 + $0x8] sm:$0xff]  ;;  %v4122_v3 = vld [vmem:[%s588_s22] sm:$0xff]  ;;  %vm677_vm1 = vcmask 261120   ;;  %s5067_s29 = scalar_lea.vmem %s5044_s3, %s4506_s15  ;;  %s4403_s22 = smov 96   ;;  %vm702_vm2 = vcmask 64512   ;;  %vm805_vm3 = vcmask 1043456   ;;  %v641_v32 = vlaneseq }
  0x21   : > { %687 = vmatpush.bf16.msra.mxu0 %v4123_v2  ;;  %v4314_v7 = vld [vmem:[%s5067_s29] ss:$0 sm:$0xff]  ;;  %s4404_s17 = smov 88   ;;  %s4405_s20 = smov 120   ;;  %v4408_v38 = vmov 0.0  }
  0x22   : > { %s4406_s21 = smov 56   ;;  %s4407_s16 = smov 80   ;;  %v642_v33 = vshrl.u32 %v641_v32, 7  ;;  %v644_v34 = vand.u32 127, %v641_v32 }
  0x23   : > { %s5068_s1 = sld [smem:[#allocation7_spill]]  ;;  %s4409_s18 = smov 112  }
  0x24   : > { %vm645_vm4 = vcmp.gt.s32.totalorder %v644_v34, %v642_v33  ;;  %s4410_s26 = smov 64   ;;  %s4411_s29 = smov 48  }
  0x25   : > { %v4569_v4 = vld [vmem:[#allocation2] sm:$0xff]  ;;  %688 = vmatpush.bf16.msra.mxu0 %v4122_v3  ;;  %v646_v39 = vsel %vm645_vm4, -inf, %v4408_v38  ;;  %s5069_s24 = scalar_lea.vmem %s5046_s5, %s4506_s15  ;;  %p4288_p5 = scmp.eq.s32.totalorder %s4500_s30, 4 }
  0x26   : > { %v4571_v5 = vld [vmem:[#allocation2 + $0x8] sm:$0xff] }
  0x27   : > { %v656_v6 = vpack.c.bf16 %v4571_v5, %v4569_v4 }
  0x29   : > { %3434 = vmatmul.msk.bf16.vlgmr.msra.gmra.mxu0 %vm677_vm1, %v656_v6  ;;  %v647_v35 = vld [vmem:[%s5068_s1] sm:$0x3]  ;;  %s5070_s1 = scalar_lea.vmem %s5047_s6, %s4506_s15 }
  0x2a   : > { %v649_v36 = vrot.slane %v647_v35, 1  ;;  %v650_v41 = vperm.slane %v647_v35, 0 }
  0x2c   : > { %v651_v37 = vperm.slane %v649_v36, 0  ;;  %v4610_v42 = vadd.f32 %v650_v41, %v646_v39 }
  0x2e   : > { %v4608_v40 = vadd.f32 %v651_v37, %v646_v39 }
  0xa6   : > { %v690_v8 = vpop.f32.mrf.mxu0 }
  0xa7   : > { %v691_v9 = vadd.f32 %v4314_v7, %v690_v8 }
  0xa9   : > { %v695_v10 = vpack.c.bf16 %v691_v9, %v691_v9 }
  0xab   : > { %v698_v11 = vunpack.c.l.b16 %v695_v10 }
  0xad   : > { %v4581_v12 = vpack.c.b16 %v698_v11, %v698_v11 }
  0xae   : > { %v692_v13 = vpop.f32.mrf.mxu0 }
  0xaf   : > { %v693_v14 = vadd.f32 %v4314_v7, %v692_v13  ;;  %700 = vrot.lane.b32.xlu1 %v4581_v12, %s4403_s22  ;;  %847 = vrot.lane.b32.xlu0 %v4581_v12, %s4404_s17 }
  0xb1   : > { %v696_v15 = vpack.c.bf16 %v693_v14, %v693_v14 }
  0xb3   : > { %v723_v16 = vunpack.c.l.b16 %v696_v15 }
  0xb5   : > { %v4585_v17 = vpack.c.b16 %v723_v16, %v723_v16 }
  0xb7   : > { %870 = vrot.lane.b32.xlu2 %v4585_v17, %s4404_s17  ;;  %725 = vrot.lane.b32.xlu1 %v4585_v17, %s4403_s22  ;;  %s4412_s22 = smov 72   ;;  %s4413_s17 = smov 104  }
  0xb8   : > { %845 = vrot.lane.b32.xlu0 %v4581_v12, %s4405_s20 }
  0xbf   : > { %868 = vrot.lane.b32.xlu2 %v4585_v17, %s4405_s20  ;;  %s4414_s20 = smov 40  }
  0xc7   : > { %945 = vrot.lane.b32.xlu2 %v4581_v12, %s4406_s21 }
  0xcf   : > { %1032 = vrot.lane.b32.xlu2 %v4581_v12, %s4407_s16 }
 0x111   : > { %v871_v18 = vpop.permute.xlu2 %870 }
 0x112   : > { %v876_v24 = vsel %vm702_vm2, %v871_v18, 0 }
 0x119   : > { %v869_v19 = vpop.permute.xlu2 %868 }
 0x121   : > { %v701_v20 = vpop.permute.xlu1 %700  ;;  %v848_v21 = vpop.permute.xlu0 %847 }
 0x122   : > { %v707_v22 = vsel %vm702_vm2, %v701_v20, 0  ;;  %v853_v23 = vsel %vm702_vm2, %v848_v21, 0  ;;  %v946_v25 = vpop.permute.xlu2 %945 }
 0x123   : > { %716 = vmatpush.bf16.xpose.msra.mxu1 %v707_v22  ;;  %862 = vmatpush.bf16.xpose.msrb.mxu0 %v853_v23  ;;  %v951_v29 = vsel %vm805_vm3, %v946_v25, 0 }
 0x129   : > { %v726_v26 = vpop.permute.xlu1 %725 }
 0x12a   : > { %v846_v27 = vpop.permute.xlu0 %845  ;;  %3435 = vmatmul.msk.bf16.vlgmr.msra.gmra.mxu1 %vm702_vm2, %v695_v10  ;;  %v731_v28 = vsel %vm702_vm2, %v726_v26, 0  ;;  %v1033_v30 = vpop.permute.xlu2 %1032 }
 0x12b   : > { %885 = vmatpush.bf16.xpose.msrb.mxu1 %v876_v24  ;;  %3439 = vmatmul.msk.bf16.vlgmr.msrb.gmra.mxu0 %vm702_vm2, %v846_v27  ;;  %v1038_v31 = vsel %vm702_vm2, %v1033_v30, 0 }
 0x12c   : > { %740 = vmatpush.bf16.xpose.msra.mxu2 %v731_v28 }
 0x133   : > { %3436 = vmatmul.msk.bf16.vlgmr.msra.gmra.mxu2 %vm702_vm2, %v696_v15 }
 0x134   : > { %960 = vmatpush.bf16.msrb.mxu2 %v951_v29 }
 0x138   : > { %1047 = vmatpush.bf16.xpose.msra.mxu2 %v1038_v31 }
 0x13a   : > { %3440 = vmatmul.msk.bf16.vlgmr.msrb.gmra.mxu1 %vm702_vm2, %v869_v19 }
 0x1a7   : > { %v718_v43 = vpop.f32.mrf.mxu1 }
 0x1a8   : > { %v746_v44 = vmul.f32 0.35355338, %v718_v43  ;;  %v864_v45 = vpop.f32.mrf.mxu0 }
 0x1a9   : > { %v891_v46 = vmul.f32 0.35355338, %v864_v45 }
 0x1aa   : > { %v748_v47 = vadd.f32 %v746_v44, %v4610_v42 }
 0x1ab   : > { %v893_v48 = vadd.f32 %v891_v46, %v4610_v42 }
 0x1ac   : > { %v750_v49 = vsel %vm702_vm2, %v748_v47, -inf }
 0x1ad   : > { %751 = vmax.xlane.f32.xlu2 %v750_v49  ;;  %v895_v50 = vsel %vm702_vm2, %v893_v48, -inf }
 0x1ae   : > { %896 = vmax.xlane.f32.xlu0 %v895_v50 }
 0x1af   : > { %v720_v51 = vpop.f32.mrf.mxu1 }
 0x1b0   : > { %v866_v52 = vpop.f32.mrf.mxu0 }
 0x1b6   : > { %v742_v53 = vpop.f32.mrf.mxu2 }
 0x1b7   : > { %v887_v54 = vpop.f32.mrf.mxu1  ;;  %v747_v2 = vmul.f32 0.35355338, %v742_v53 }
 0x1b8   : > { %v892_v8 = vmul.f32 0.35355338, %v887_v54  ;;  %v3443_v54 = vld [vmem:[%s4519_s25 + $0x4] sm:$0xf] }
 0x1b9   : > { %v749_v6 = vadd.f32 %v747_v2, %v4608_v40 }
 0x1ba   : > { %v894_v10 = vadd.f32 %v892_v8, %v4608_v40 }
 0x1bb   : > { %v753_v9 = vsel %vm702_vm2, %v749_v6, -inf }
 0x1bc   : > { %v898_v13 = vsel %vm702_vm2, %v894_v10, -inf }
 0x1be   : > { %v744_v55 = vpop.f32.mrf.mxu2 }
 0x1bf   : > { %v889_v56 = vpop.f32.mrf.mxu1  ;;  %v994_v55 = vsel %vm805_vm3, %v3443_v54, 0 }
 0x1c0   : > { %1003 = vmatpush.bf16.msra.mxu0 %v994_v55 }
 0x1c2   : > { %1030 = vrot.lane.b32.xlu0 %v4581_v12, %s4409_s18 }
 0x1ca   : > { %800 = vrot.lane.b32.xlu0 %v4581_v12, %s4410_s26 }
 0x1d2   : > { %966 = vrot.lane.b32.xlu0 %v4585_v17, %s4406_s21 }
 0x1da   : > { %1053 = vrot.lane.b32.xlu0 %v4585_v17, %s4409_s18 }
 0x220   : > { %v752_v57 = vpop.xlane.xlu2 %751 }
 0x221   : > { %v756_v58 = vsub.f32 %v748_v47, %v752_v57  ;;  %v897_v59 = vpop.xlane.xlu0 %896 }
 0x222   : > { %v901_v60 = vsub.f32 %v893_v48, %v897_v59 }
 0x223   : > { %v758_v61 = vmul.f32 1.442695, %v756_v58 }
 0x224   : > { %v903_v62 = vmul.f32 1.442695, %v901_v60 }
 0x225   : > { %4321 = vpow2.f32 %v758_v61 }
 0x226   : > { %4323 = vpow2.f32 %v903_v62 }
 0x22b   : > { %v4322_v63 = vpop.eup %4321 }
 0x22c   : > { %v4324_v0 = vpop.eup %4323  ;;  %v762_v1 = vsel %vm702_vm2, %v4322_v63, 0.0 }
 0x22d   : > { %763 = vadd.xlane.f32.xlu2 %v762_v1  ;;  %v907_v3 = vsel %vm702_vm2, %v4324_v0, 0.0 }
 0x22e   : > { %908 = vadd.xlane.f32.xlu1 %v907_v3 }
 0x234   : > { %v1031_v7 = vpop.permute.xlu0 %1030 }
 0x236   : > { %754 = vmax.xlane.f32.xlu1 %v753_v9 }
 0x23c   : > { %v801_v11 = vpop.permute.xlu0 %800 }
 0x23d   : > { %v807_v14 = vsel %vm805_vm3, %v801_v11, 0 }
 0x23e   : > { %899 = vmax.xlane.f32.xlu1 %v898_v13  ;;  %816 = vmatpush.bf16.msra.mxu3 %v807_v14 }
 0x244   : > { %v967_v13 = vpop.permute.xlu0 %966 }
 0x2a0   : > { %v764_v15 = vpop.xlane.xlu2 %763 }
 0x2a1   : > { %4325 = vrcp.f32 %v764_v15  ;;  %v909_v16 = vpop.xlane.xlu1 %908  ;;  %v779_v25 = vand.u32 2147483648, %v764_v15  ;;  %v777_v27 = vand.u32 2147483647, %v764_v15  ;;  %vm773_vm7 = vweird.f32 %v764_v15 }
 0x2a2   : > { %4327 = vrcp.f32 %v909_v16  ;;  %v924_v29 = vand.u32 2147483648, %v909_v16  ;;  %v922_v32 = vand.u32 2147483647, %v909_v16  ;;  %vm918_vm9 = vweird.f32 %v909_v16 }
 0x2a3   : > { %v780_v34 = vor.u32 1.1754944e-38, %v779_v25  ;;  %vm778_vm11 = vcmp.eq.f32.partialorder %v777_v27, 8.507059e+37 }
 0x2a4   : > { %v925_v36 = vor.u32 1.1754944e-38, %v924_v29  ;;  %vm923_vm12 = vcmp.eq.f32.partialorder %v922_v32, 8.507059e+37 }
 0x2a7   : > { %v4326_v18 = vpop.eup %4325 }
 0x2a8   : > { %v4328_v19 = vpop.eup %4327  ;;  %v769_v20 = vmul.f32 %v4326_v18, %v764_v15  ;;  %vm774_vm5 = vweird.f32 %v4326_v18 }
 0x2a9   : > { %v914_v21 = vmul.f32 %v4328_v19, %v909_v16  ;;  %v755_v22 = vpop.xlane.xlu1 %754  ;;  %vm919_vm6 = vweird.f32 %v4328_v19  ;;  %vm775_vm8 = vmor %vm773_vm7, %vm774_vm5 }
 0x2aa   : > { %v770_v23 = vsub.f32 1.0, %v769_v20  ;;  %v757_v24 = vsub.f32 %v749_v6, %v755_v22  ;;  %vm920_vm10 = vmor %vm918_vm9, %vm919_vm6 }
 0x2ab   : > { %v915_v26 = vsub.f32 1.0, %v914_v21 }
 0x2ac   : > { %v771_v28 = vmul.f32 %v4326_v18, %v770_v23  ;;  %v760_v30 = vmul.f32 1.442695, %v757_v24  ;;  %v972_v23 = vsel %vm805_vm3, %v967_v13, 0 }
 0x2ad   : > { %v916_v31 = vmul.f32 %v4328_v19, %v915_v26 }
 0x2ae   : > { %4329 = vpow2.f32 %v760_v30  ;;  %v772_v33 = vadd.f32 %v4326_v18, %v771_v28 }
 0x2af   : > { %v917_v35 = vadd.f32 %v4328_v19, %v916_v31 }
 0x2b0   : > { %v776_v37 = vsel %vm775_vm8, %v4326_v18, %v772_v33 }
 0x2b1   : > { %v900_v38 = vpop.xlane.xlu1 %899  ;;  %v781_v39 = vsel %vm778_vm11, %v780_v34, %v776_v37  ;;  %v921_v41 = vsel %vm920_vm10, %v4328_v19, %v917_v35 }
 0x2b2   : > { %v902_v43 = vsub.f32 %v894_v10, %v900_v38  ;;  %v782_v44 = vmul.f32 %v4322_v63, %v781_v39  ;;  %v926_v45 = vsel %vm923_vm12, %v925_v36, %v921_v41 }
 0x2b3   : > { %v927_v46 = vmul.f32 %v4324_v0, %v926_v45 }
 0x2b4   : > { %v4330_v47 = vpop.eup %4329  ;;  %v905_v48 = vmul.f32 1.442695, %v902_v43  ;;  %v798_v49 = vpack.c.bf16 %v782_v44, %v782_v44  ;;  %v1054_v43 = vpop.permute.xlu0 %1053 }
 0x2b5   : > { %v765_v50 = vsel %vm702_vm2, %v4330_v47, 0.0  ;;  %v943_v51 = vpack.c.bf16 %v927_v46, %v927_v46  ;;  %v844_v46 = vld [vmem:[%s4519_s25] sm:$0xf] }
 0x2b6   : > { %4331 = vpow2.f32 %v905_v48  ;;  %766 = vadd.xlane.f32.xlu1 %v765_v50  ;;  %3437 = vmatmul.msk.bf16.vlgmr.msra.gmra.mxu3 %vm702_vm2, %v798_v49 }
 0x2b7   : > { %3441 = vmatmul.msk.bf16.vlgmr.msrb.gmra.mxu2 %vm702_vm2, %v943_v51 }
 0x2bc   : > { %v4632_v52 = vpop.eup %4331 }
 0x2bd   : > { %v910_v53 = vsel %vm702_vm2, %v4632_v52, 0.0 }
 0x2be   : > { %911 = vadd.xlane.f32.xlu2 %v910_v53 }
 0x2c7   : > { %3446 = vmatmul.msk.bf16.vlgmr.msra.gmra.mxu2 %vm702_vm2, %v1031_v7 }
 0x2cf   : > { %822 = vrot.lane.b32.xlu1 %v4585_v17, %s4410_s26 }
 0x2d6   : > { %1055 = vrot.lane.b32.xlu2 %v4585_v17, %s4407_s16 }
 0x2de   : > { %1130 = vrot.lane.b32.xlu2 %v4581_v12, %s4411_s29 }
 0x2e6   : > { %1199 = vrot.lane.b32.xlu2 %v4581_v12, %s4412_s22 }
 0x2ee   : > { %1222 = vrot.lane.b32.xlu2 %v4585_v17, %s4412_s22 }
 0x2f6   : > { %1197 = vrot.lane.b32.xlu2 %v4581_v12, %s4413_s17 }
 0x329   : > { %v767_v56 = vpop.xlane.xlu1 %766 }
 0x32a   : > { %4333 = vrcp.f32 %v767_v56  ;;  %v794_v63 = vand.u32 2147483648, %v767_v56  ;;  %vm788_vm14 = vweird.f32 %v767_v56  ;;  %v792_v1 = vand.u32 2147483647, %v767_v56 }
 0x32c   : > { %v795_v9 = vor.u32 1.1754944e-38, %v794_v63  ;;  %vm793_vm0 = vcmp.eq.f32.partialorder %v792_v1, 8.507059e+37 }
 0x330   : > { %v4334_v57 = vpop.eup %4333 }
 0x331   : > { %v784_v58 = vmul.f32 %v4334_v57, %v767_v56  ;;  %v912_v59 = vpop.xlane.xlu2 %911  ;;  %vm789_vm13 = vweird.f32 %v4334_v57 }
 0x332   : > { %4335 = vrcp.f32 %v912_v59  ;;  %vm790_vm15 = vmor %vm788_vm14, %vm789_vm13  ;;  %v939_v27 = vand.u32 2147483648, %v912_v59  ;;  %vm933_vm5 = vweird.f32 %v912_v59  ;;  %v937_v28 = vand.u32 2147483647, %v912_v59 }
 0x333   : > { %v785_v60 = vsub.f32 1.0, %v784_v58 }
 0x334   : > { %v940_v31 = vor.u32 1.1754944e-38, %v939_v27  ;;  %vm938_vm7 = vcmp.eq.f32.partialorder %v937_v28, 8.507059e+37 }
 0x335   : > { %v786_v61 = vmul.f32 %v4334_v57, %v785_v60 }
 0x337   : > { %v787_v62 = vadd.f32 %v4334_v57, %v786_v61 }
 0x338   : > { %v4336_v0 = vpop.eup %4335 }
 0x339   : > { %v1056_v2 = vpop.permute.xlu2 %1055  ;;  %v4649_v3 = vpop.f32.mrf.mxu3  ;;  %v929_v6 = vmul.f32 %v4336_v0, %v912_v59  ;;  %v791_v8 = vsel %vm790_vm15, %v4334_v57, %v787_v62  ;;  %vm934_vm4 = vweird.f32 %v4336_v0 }
 0x33a   : > { %v4651_v7 = vpop.f32.mrf.mxu2  ;;  %v796_v10 = vsel %vm793_vm0, %v795_v9, %v791_v8  ;;  %v1061_v26 = vsel %vm702_vm2, %v1056_v2, 0  ;;  %vm935_vm6 = vmor %vm933_vm5, %vm934_vm4 }
 0x33b   : > { %v930_v11 = vsub.f32 1.0, %v929_v6  ;;  %v797_v14 = vmul.f32 %v4330_v47, %v796_v10  ;;  %v1014_v47 = vsel %vm805_vm3, %v844_v46, 0 }
 0x33c   : > { %1023 = vmatpush.bf16.msra.mxu1 %v1014_v47 }
 0x33d   : > { %v931_v18 = vmul.f32 %v4336_v0, %v930_v11  ;;  %v799_v24 = vpack.c.bf16 %v797_v14, %v797_v14 }
 0x33f   : > { %v932_v25 = vadd.f32 %v4336_v0, %v931_v18 }
 0x341   : > { %v1131_v15 = vpop.permute.xlu2 %1130  ;;  %v823_v16 = vpop.permute.xlu1 %822  ;;  %v936_v29 = vsel %vm935_vm6, %v4336_v0, %v932_v25 }
 0x342   : > { %v1136_v19 = vsel %vm805_vm3, %v1131_v15, 0  ;;  %v820_v20 = vpop.f32.mrf.mxu3  ;;  %v964_v21 = vpop.f32.mrf.mxu2  ;;  %v828_v22 = vsel %vm805_vm3, %v823_v16, 0  ;;  %v941_v33 = vsel %vm938_vm7, %v940_v31, %v936_v29 }
 0x343   : > { %837 = vmatpush.bf16.msrb.mxu3 %v828_v22  ;;  %1145 = vmatpush.bf16.msrb.mxu0 %v1136_v19  ;;  %v942_v36 = vmul.f32 %v4632_v52, %v941_v33 }
 0x345   : > { %v944_v39 = vpack.c.bf16 %v942_v36, %v942_v36 }
 0x346   : > { %3438 = vmatmul.msk.bf16.vlgmr.msrb.gmra.mxu3 %vm702_vm2, %v799_v24 }
 0x347   : > { %981 = vmatpush.bf16.msra.mxu3 %v972_v23 }
 0x349   : > { %v1200_v38 = vpop.permute.xlu2 %1199 }
 0x34a   : > { %v1049_v30 = vpop.f32.mrf.mxu2  ;;  %v1205_v41 = vsel %vm702_vm2, %v1200_v38, 0 }
 0x34b   : > { %1070 = vmatpush.bf16.xpose.msrb.mxu3 %v1061_v26  ;;  %v1076_v32 = vmul.f32 0.35355338, %v1049_v30 }
 0x34d   : > { %v1078_v34 = vadd.f32 %v1076_v32, %v4610_v42 }
 0x34f   : > { %v1080_v35 = vsel %vm702_vm2, %v1078_v34, -inf }
 0x350   : > { %1081 = vmax.xlane.f32.xlu0 %v1080_v35 }
 0x351   : > { %v1223_v44 = vpop.permute.xlu2 %1222 }
 0x352   : > { %v1051_v37 = vpop.f32.mrf.mxu2  ;;  %v1228_v58 = vsel %vm702_vm2, %v1223_v44, 0 }
 0x356   : > { %3442 = vmatmul.msk.bf16.vlgmr.msra.gmra.mxu3 %vm702_vm2, %v944_v39 }
 0x357   : > { %1214 = vmatpush.bf16.xpose.msra.mxu3 %v1205_v41 }
 0x359   : > { %v1198_v45 = vpop.permute.xlu2 %1197 }
 0x364   : > { %1220 = vrot.lane.b32.xlu0 %v4585_v17, %s4413_s17 }
 0x366   : > { %3447 = vmatmul.msk.bf16.vlgmr.msrb.gmra.mxu3 %vm702_vm2, %v1054_v43 }
 0x376   : > { %3452 = vmatmul.msk.bf16.vlgmr.msra.gmra.mxu3 %vm702_vm2, %v1198_v45 }
 0x3c3   : > { %v1082_v48 = vpop.xlane.xlu0 %1081 }
 0x3c4   : > { %v1086_v49 = vsub.f32 %v1078_v34, %v1082_v48 }
 0x3c6   : > { %v1088_v50 = vmul.f32 1.442695, %v1086_v49 }
 0x3c8   : > { %4337 = vpow2.f32 %v1088_v50 }
 0x3c9   : > { %v839_v51 = vpop.f32.mrf.mxu3 }
 0x3ca   : > { %v843_v52 = vpack.c.bf16 %v839_v51, %v4649_v3 }
 0x3cc   : > { %3445 = vmatmul.msk.bf16.vlgmr.msra.gmra.mxu1 %vm702_vm2, %v843_v52 }
 0x3ce   : > { %v4338_v53 = vpop.eup %4337 }
 0x3cf   : > { %v1092_v54 = vsel %vm702_vm2, %v4338_v53, 0.0 }
 0x3d0   : > { %1093 = vadd.xlane.f32.xlu1 %v1092_v54 }
 0x3d1   : > { %v841_v55 = vpop.f32.mrf.mxu3 }
 0x3d6   : > { %v1221_v26 = vpop.permute.xlu0 %1220 }
 0x3d9   : > { %v983_v56 = vpop.f32.mrf.mxu3 }
 0x3da   : > { %v987_v57 = vpack.c.bf16 %v983_v56, %v4651_v7 }
 0x3dc   : > { %3444 = vmatmul.msk.bf16.vlgmr.msra.gmra.mxu0 %vm702_vm2, %v987_v57 }
 0x3dd   : > { %1237 = vmatpush.bf16.xpose.msra.mxu0 %v1228_v58 }
 0x3e1   : > { %v985_v59 = vpop.f32.mrf.mxu3 }
 0x3e9   : > { %v1072_v60 = vpop.f32.mrf.mxu3 }
 0x3ea   : > { %v1077_v61 = vmul.f32 0.35355338, %v1072_v60  ;;  %v3450_v60 = vld [vmem:[%s4519_s25 + $0x8] sm:$0xf] }
 0x3ec   : > { %v1079_v62 = vadd.f32 %v1077_v61, %v4608_v40  ;;  %v1179_v61 = vsel %vm805_vm3, %v3450_v60, 0 }
 0x3ed   : > { %1188 = vmatpush.bf16.msrb.mxu2 %v1179_v61 }
 0x3ee   : > { %v1083_v63 = vsel %vm702_vm2, %v1079_v62, -inf }
 0x3ef   : > { %1084 = vmax.xlane.f32.xlu2 %v1083_v63 }
 0x3f1   : > { %v1074_v0 = vpop.f32.mrf.mxu3 }
 0x3f9   : > { %v1216_v1 = vpop.f32.mrf.mxu3 }
 0x3fa   : > { %v1243_v29 = vmul.f32 0.35355338, %v1216_v1 }
 0x3fc   : > { %v1245_v30 = vadd.f32 %v1243_v29, %v4610_v42 }
 0x3fe   : > { %v1247_v31 = vsel %vm702_vm2, %v1245_v30, -inf }
 0x401   : > { %v1218_v2 = vpop.f32.mrf.mxu3 }
 0x443   : > { %v1094_v3 = vpop.xlane.xlu1 %1093 }
 0x444   : > { %4339 = vrcp.f32 %v1094_v3  ;;  %v1109_v9 = vand.u32 2147483648, %v1094_v3  ;;  %v1107_v11 = vand.u32 2147483647, %v1094_v3  ;;  %vm1103_vm9 = vweird.f32 %v1094_v3 }
 0x446   : > { %v1110_v14 = vor.u32 1.1754944e-38, %v1109_v9  ;;  %vm1108_vm11 = vcmp.eq.f32.partialorder %v1107_v11, 8.507059e+37 }
 0x449   : > { %v1025_v20 = vpop.f32.mrf.mxu1 }
 0x44a   : > { %v4340_v6 = vpop.eup %4339 }
 0x44b   : > { %v1099_v7 = vmul.f32 %v4340_v6, %v1094_v3  ;;  %vm1104_vm8 = vweird.f32 %v4340_v6 }
 0x44c   : > { %vm1105_vm10 = vmor %vm1103_vm9, %vm1104_vm8 }
 0x44d   : > { %v1100_v8 = vsub.f32 1.0, %v1099_v7 }
 0x44f   : > { %v1101_v10 = vmul.f32 %v4340_v6, %v1100_v8 }
 0x451   : > { %v1102_v13 = vadd.f32 %v4340_v6, %v1101_v10 }
 0x453   : > { %v1106_v15 = vsel %vm1105_vm10, %v4340_v6, %v1102_v13  ;;  %v4698_v6 = vpop.f32.mrf.mxu1 }
 0x454   : > { %v1111_v16 = vsel %vm1108_vm11, %v1110_v14, %v1106_v15 }
 0x455   : > { %v1112_v18 = vmul.f32 %v4338_v53, %v1111_v16 }
 0x457   : > { %v1128_v19 = vpack.c.bf16 %v1112_v18, %v1112_v18 }
 0x459   : > { %v1005_v21 = vpop.f32.mrf.mxu0  ;;  %3448 = vmatmul.msk.bf16.vlgmr.msrb.gmra.mxu0 %vm702_vm2, %v1128_v19 }
 0x45a   : > { %v4678_v22 = vadd.f32 %v1025_v20, %v1005_v21 }
 0x461   : > { %v4686_v32 = vpop.f32.mrf.mxu0 }
 0x462   : > { %v1085_v23 = vpop.xlane.xlu2 %1084 }
 0x463   : > { %v1087_v24 = vsub.f32 %v1079_v62, %v1085_v23 }
 0x465   : > { %v1090_v25 = vmul.f32 1.442695, %v1087_v24 }
 0x467   : > { %4341 = vpow2.f32 %v1090_v25 }
 0x469   : > { %3453 = vmatmul.msk.bf16.vlgmr.msra.gmra.mxu0 %vm702_vm2, %v1221_v26 }
 0x46d   : > { %v4342_v27 = vpop.eup %4341 }
 0x46e   : > { %v1095_v28 = vsel %vm702_vm2, %v4342_v27, 0.0 }
 0x46f   : > { %1096 = vadd.xlane.f32.xlu1 %v1095_v28 }
 0x488   : > { %1151 = vrot.lane.b32.xlu1 %v4585_v17, %s4411_s29  ;;  %s5071_s29 = scalar_lea.vmem %s5048_s7, %s4506_s15  ;;  %s5072_s15 = sld [smem:[#allocation10_spill]] }
 0x4b2   : > { %1248 = vmax.xlane.f32.xlu1 %v1247_v31 }
 0x4d6   : > { %v1147_v33 = vpop.f32.mrf.mxu0 }
 0x4de   : > { %v1149_v34 = vpop.f32.mrf.mxu0 }
 0x4e2   : > { %v1097_v35 = vpop.xlane.xlu1 %1096 }
 0x4e3   : > { %4343 = vrcp.f32 %v1097_v35  ;;  %v1124_v47 = vand.u32 2147483648, %v1097_v35  ;;  %vm1118_vm13 = vweird.f32 %v1097_v35  ;;  %v1122_v48 = vand.u32 2147483647, %v1097_v35 }
 0x4e5   : > { %v1125_v50 = vor.u32 1.1754944e-38, %v1124_v47  ;;  %vm1123_vm15 = vcmp.eq.f32.partialorder %v1122_v48, 8.507059e+37 }
 0x4e6   : > { %v1239_v36 = vpop.f32.mrf.mxu0 }
 0x4e7   : > { %v1244_v37 = vmul.f32 0.35355338, %v1239_v36 }
 0x4e9   : > { %v4344_v38 = vpop.eup %4343  ;;  %v1246_v39 = vadd.f32 %v1244_v37, %v4608_v40 }
 0x4ea   : > { %v1114_v41 = vmul.f32 %v4344_v38, %v1097_v35  ;;  %vm1119_vm12 = vweird.f32 %v4344_v38 }
 0x4eb   : > { %v1250_v43 = vsel %vm702_vm2, %v1246_v39, -inf  ;;  %vm1120_vm14 = vmor %vm1118_vm13, %vm1119_vm12 }
 0x4ec   : > { %v1115_v44 = vsub.f32 1.0, %v1114_v41  ;;  %1251 = vmax.xlane.f32.xlu0 %v1250_v43 }
 0x4ee   : > { %v1116_v42 = vmul.f32 %v4344_v38, %v1115_v44  ;;  %v1241_v45 = vpop.f32.mrf.mxu0 }
 0x4f0   : > { %v1117_v46 = vadd.f32 %v4344_v38, %v1116_v42  ;;  %v3456_v42 = vld [vmem:[%s4519_s25 + $0xc] sm:$0xf]  ;;  %s4418_s25 = smov 8  }
 0x4f1   : > { %v1346_v45 = vsel %vm805_vm3, %v3456_v42, 0 }
 0x4f2   : > { %v1121_v49 = vsel %vm1120_vm14, %v4344_v38, %v1117_v46  ;;  %1355 = vmatpush.bf16.msrb.mxu3 %v1346_v45 }
 0x4f3   : > { %v1126_v51 = vsel %vm1123_vm15, %v1125_v50, %v1121_v49 }
 0x4f4   : > { %v1127_v52 = vmul.f32 %v4342_v27, %v1126_v51 }
 0x4f6   : > { %v1129_v54 = vpack.c.bf16 %v1127_v52, %v1127_v52  ;;  %v4315_v52 = vld [vmem:[%s5069_s24] ss:$0 sm:$0xff]  ;;  %s4417_s24 = smov 128  }
 0x4fa   : > { %v1152_v40 = vpop.permute.xlu1 %1151 }
 0x4fb   : > { %v1157_v53 = vsel %vm805_vm3, %v1152_v40, 0 }
 0x4fc   : > { %1166 = vmatpush.bf16.msrb.mxu1 %v1157_v53 }
 0x4ff   : > { %3449 = vmatmul.msk.bf16.vlgmr.msrb.gmra.mxu1 %vm702_vm2, %v1129_v54  ;;  %v1028_v54 = vadd.f32 %v4698_v6, %v4686_v32 }
 0x500   : > { %1297 = vrot.lane.b32.xlu0 %v4581_v12, %s4414_s20 }
 0x525   : > { %v1249_v55 = vpop.xlane.xlu1 %1248 }
 0x526   : > { %v1253_v56 = vsub.f32 %v1245_v30, %v1249_v55 }
 0x528   : > { %v1255_v57 = vmul.f32 1.442695, %v1253_v56 }
 0x52a   : > { %4345 = vpow2.f32 %v1255_v57 }
 0x530   : > { %v4346_v58 = vpop.eup %4345 }
 0x531   : > { %v1259_v59 = vsel %vm702_vm2, %v4346_v58, 0.0 }
 0x532   : > { %1260 = vadd.xlane.f32.xlu2 %v1259_v59 }
 0x55f   : > { %v1252_v62 = vpop.xlane.xlu0 %1251 }
 0x560   : > { %v1254_v63 = vsub.f32 %v1246_v39, %v1252_v62 }
 0x562   : > { %v1257_v0 = vmul.f32 1.442695, %v1254_v63  ;;  %v4415_v63 = vmov 32.0  }
 0x564   : > { %4347 = vpow2.f32 %v1257_v0 }
 0x56a   : > { %v4348_v1 = vpop.eup %4347 }
 0x56b   : > { %v1262_v2 = vsel %vm702_vm2, %v4348_v1, 0.0 }
 0x56c   : > { %1263 = vadd.xlane.f32.xlu2 %v1262_v2 }
 0x572   : > { %v1298_v12 = vpop.permute.xlu0 %1297 }
 0x573   : > { %v1303_v3 = vsel %vm805_vm3, %v1298_v12, 0 }
 0x574   : > { %1312 = vmatpush.bf16.msra.mxu1 %v1303_v3 }
 0x57c   : > { %v1168_v7 = vpop.f32.mrf.mxu1 }
 0x57d   : > { %v1172_v8 = vpack.c.bf16 %v1168_v7, %v1147_v33 }
 0x57f   : > { %3451 = vmatmul.msk.bf16.vlgmr.msrb.gmra.mxu2 %vm702_vm2, %v1172_v8 }
 0x584   : > { %v1170_v9 = vpop.f32.mrf.mxu1  ;;  %1318 = vrot.lane.b32.xlu2 %v4585_v17, %s4414_s20 }
 0x5a5   : > { %v1261_v10 = vpop.xlane.xlu2 %1260 }
 0x5a6   : > { %4349 = vrcp.f32 %v1261_v10  ;;  %v1276_v15 = vand.u32 2147483648, %v1261_v10  ;;  %v1274_v18 = vand.u32 2147483647, %v1261_v10  ;;  %vm1270_vm4 = vweird.f32 %v1261_v10 }
 0x5a8   : > { %v1277_v20 = vor.u32 1.1754944e-38, %v1276_v15  ;;  %vm1275_vm6 = vcmp.eq.f32.partialorder %v1274_v18, 8.507059e+37  ;;  %v3524_v15 = vld [vmem:[%s4537_s2 + $0x80] sm:$0xf]  ;;  %v4140_v18 = vld [vmem:[%s4537_s2 + $0x84] sm:$0xf] }
 0x5ac   : > { %v4350_v11 = vpop.eup %4349 }
 0x5ad   : > { %v1266_v13 = vmul.f32 %v4350_v11, %v1261_v10  ;;  %vm1271_vm0 = vweird.f32 %v4350_v11 }
 0x5ae   : > { %vm1272_vm5 = vmor %vm1270_vm4, %vm1271_vm0 }
 0x5af   : > { %v1267_v14 = vsub.f32 1.0, %v1266_v13 }
 0x5b1   : > { %v1268_v16 = vmul.f32 %v4350_v11, %v1267_v14 }
 0x5b3   : > { %v1269_v19 = vadd.f32 %v4350_v11, %v1268_v16  ;;  %v4148_v16 = vld [vmem:[%s4537_s2 + $0xbc] sm:$0xf0] }
 0x5b5   : > { %v1273_v21 = vsel %vm1272_vm5, %v4350_v11, %v1269_v19  ;;  %v3525_v19 = vor.u32 %v4148_v16, %v3524_v15 }
 0x5b6   : > { %v1278_v23 = vsel %vm1275_vm6, %v1277_v20, %v1273_v21  ;;  %v3526_v20 = vld [vmem:[%s4537_s2 + $0xc0] sm:$0xf0]  ;;  %v3532_v21 = vld [vmem:[%s4537_s2 + $0x88] sm:$0xf] }
 0x5b7   : > { %v1279_v24 = vmul.f32 %v4346_v58, %v1278_v23  ;;  %v4149_v23 = vld [vmem:[%s4537_s2 + $0xc4] sm:$0xf0]  ;;  %1673 = vmatpush.bf16.msrb.mxu0 %v3525_v19 }
 0x5b9   : > { %v1295_v25 = vpack.c.bf16 %v1279_v24, %v1279_v24 }
 0x5bb   : > { %3454 = vmatmul.msk.bf16.vlgmr.msra.gmra.mxu1 %vm702_vm2, %v1295_v25  ;;  %v3529_v25 = vor.u32 %v4140_v18, %v3526_v20 }
 0x5bd   : > { %1687 = vmatpush.bf16.msrb.mxu1 %v3529_v25 }
 0x5df   : > { %v1264_v17 = vpop.xlane.xlu2 %1263 }
 0x5e0   : > { %4351 = vrcp.f32 %v1264_v17  ;;  %v1291_v31 = vand.u32 2147483648, %v1264_v17  ;;  %v1289_v34 = vand.u32 2147483647, %v1264_v17  ;;  %vm1285_vm8 = vweird.f32 %v1264_v17 }
 0x5e1   : > { %4353 = vrcp.f32 %v4415_v63 }
 0x5e2   : > { %v1292_v36 = vor.u32 1.1754944e-38, %v1291_v31  ;;  %vm1290_vm10 = vcmp.eq.f32.partialorder %v1289_v34, 8.507059e+37  ;;  %v4132_v31 = vld [vmem:[%s4537_s2 + $0x3c] sm:$0xf0] }
 0x5e6   : > { %v4352_v26 = vpop.eup %4351 }
 0x5e7   : > { %v1281_v27 = vmul.f32 %v4352_v26, %v1264_v17  ;;  %v1319_v28 = vpop.permute.xlu2 %1318  ;;  %vm1286_vm7 = vweird.f32 %v4352_v26  ;;  %v4354_v0 = vpop.eup %4353  ;;  %v3533_v17 = vor.u32 %v4149_v23, %v3532_v21  ;;  %v4316_v21 = vld [vmem:[%s5070_s1] ss:$0 sm:$0xff] }
 0x5e8   : > { %v1324_v29 = vsel %vm805_vm3, %v1319_v28, 0  ;;  %vm1287_vm9 = vmor %vm1285_vm8, %vm1286_vm7 }
 0x5e9   : > { %v1282_v30 = vsub.f32 1.0, %v1281_v27  ;;  %1333 = vmatpush.bf16.msra.mxu2 %v1324_v29  ;;  %v3534_v27 = vld [vmem:[%s4537_s2 + $0xc8] sm:$0xf0] }
 0x5eb   : > { %v1283_v33 = vmul.f32 %v4352_v26, %v1282_v30  ;;  %v3460_v30 = vld [vmem:[%s4537_s2] sm:$0xf] }
 0x5ed   : > { %v1284_v35 = vadd.f32 %v4352_v26, %v1283_v33  ;;  %1701 = vmatpush.bf16.msrb.mxu2 %v3533_v17  ;;  %v4124_v33 = vld [vmem:[%s4537_s2 + $0x4] sm:$0xf]  ;;  %v4317_v17 = vld [vmem:[%s5071_s29] ss:$0 sm:$0xff] }
 0x5ef   : > { %v1288_v37 = vsel %vm1287_vm9, %v4352_v26, %v1284_v35  ;;  %v4141_v26 = vld [vmem:[%s4537_s2 + $0x8c] sm:$0xf]  ;;  %v3461_v35 = vor.u32 %v4132_v31, %v3460_v30  ;;  %v4144_v30 = vld [vmem:[%s4537_s2 + $0xa4] sm:$0xf] }
 0x5f0   : > { %v1293_v38 = vsel %vm1290_vm10, %v1292_v36, %v1288_v37  ;;  %v3537_v29 = vor.u32 %v4141_v26, %v3534_v27  ;;  %v3462_v36 = vld [vmem:[%s4537_s2 + $0x40] sm:$0xf0]  ;;  %v3468_v37 = vld [vmem:[%s4537_s2 + $0x8] sm:$0xf] }
 0x5f1   : > { %v1294_v39 = vmul.f32 %v4348_v1, %v1293_v38  ;;  %v1381_v1 = vmul.f32 32.0, %v4354_v0  ;;  %v3465_v38 = vor.u32 %v4124_v33, %v3462_v36  ;;  %1674 = vmatpush.bf16.msrb.mxu0 %v3461_v35  ;;  %v3558_v31 = vld [vmem:[%s4537_s2 + $0xe0] sm:$0xf0]  ;;  %v3564_v33 = vld [vmem:[%s4537_s2 + $0xa8] sm:$0xf] }
 0x5f2   : > { %1715 = vmatpush.bf16.msra.mxu3 %v3537_v29  ;;  %v3556_v29 = vld [vmem:[%s4537_s2 + $0xa0] sm:$0xf]  ;;  %v4153_v36 = vld [vmem:[%s4537_s2 + $0xe4] sm:$0xf0] }
 0x5f3   : > { %v1296_v41 = vpack.c.bf16 %v1294_v39, %v1294_v39  ;;  %v1382_v2 = vsub.f32 1.0, %v1381_v1  ;;  %v4133_v39 = vld [vmem:[%s4537_s2 + $0x44] sm:$0xf0]  ;;  %1688 = vmatpush.bf16.msrb.mxu1 %v3465_v38  ;;  %v3484_v1 = vld [vmem:[%s4537_s2 + $0x18] sm:$0xf] }
 0x5f5   : > { %3455 = vmatmul.msk.bf16.vlgmr.msra.gmra.mxu2 %vm702_vm2, %v1296_v41  ;;  %v1383_v32 = vmul.f32 %v4354_v0, %v1382_v2  ;;  %v4125_v41 = vld [vmem:[%s4537_s2 + $0xc] sm:$0xf]  ;;  %v4135_v2 = vld [vmem:[%s4537_s2 + $0x54] sm:$0xf0] }
 0x602   : > { %v1190_v43 = vpop.f32.mrf.mxu2 }
 0x603   : > { %v1195_v44 = vadd.f32 %v1190_v43, %v4678_v22  ;;  %v3470_v43 = vld [vmem:[%s4537_s2 + $0x48] sm:$0xf0] }
 0x604   : > { %v3473_v42 = vor.u32 %v4125_v41, %v3470_v43  ;;  %v3561_v41 = vor.u32 %v4144_v30, %v3558_v31  ;;  %v3492_v43 = vld [vmem:[%s4537_s2 + $0x20] sm:$0xf] }
 0x605   : > { %v4176_v30 = vld [vmem:[%s4552_s0 + $0xa0] sm:$0xff] }
 0x606   : > { %1716 = vmatpush.bf16.msra.mxu3 %v3473_v42  ;;  %v3565_v42 = vor.u32 %v4153_v36, %v3564_v33  ;;  %v4184_v31 = vld [vmem:[%s4552_s0 + $0xe0] sm:$0xff]  ;;  %v4159_v33 = vld [vmem:[%s4552_s0 + $0x18] sm:$0xff] }
 0x607   : > { %v4167_v36 = vld [vmem:[%s4552_s0 + $0x58] sm:$0xff] }
 0x60a   : > { %v1192_v48 = vpop.f32.mrf.mxu2 }
 0x60b   : > { %v1196_v56 = vadd.f32 %v1192_v48, %v1028_v54  ;;  %v4142_v48 = vld [vmem:[%s4537_s2 + $0x94] sm:$0xf]  ;;  %v4143_v54 = vld [vmem:[%s4537_s2 + $0x9c] sm:$0xf] }
 0x638   : > { %v1314_v46 = vpop.f32.mrf.mxu1 }
 0x640   : > { %v1316_v47 = vpop.f32.mrf.mxu1 }
 0x641   : > { %v4150_v47 = vld [vmem:[%s4537_s2 + $0xcc] sm:$0xf0] }
 0x678   : > { %v1335_v49 = vpop.f32.mrf.mxu2 }
 0x679   : > { %v1339_v50 = vpack.c.bf16 %v1335_v49, %v1314_v46  ;;  %v3540_v46 = vld [vmem:[%s4537_s2 + $0x90] sm:$0xf] }
 0x67b   : > { %3457 = vmatmul.msk.bf16.vlgmr.msrb.gmra.mxu3 %vm702_vm2, %v1339_v50  ;;  %vm1385_vm2 = vweird.f32 %v4354_v0  ;;  %v3541_v50 = vor.u32 %v4150_v47, %v3540_v46  ;;  %v4128_v46 = vld [vmem:[%s4537_s2 + $0x24] sm:$0xf] }
 0x67c   : > { %v3494_v47 = vld [vmem:[%s4537_s2 + $0x60] sm:$0xf0] }
 0x67d   : > { %1729 = vmatpush.bf16.msra.mxu0 %v3541_v50  ;;  %v4129_v50 = vld [vmem:[%s4537_s2 + $0x2c] sm:$0xf] }
 0x680   : > { %v1337_v51 = vpop.f32.mrf.mxu2 }
 0x681   : > { %v3542_v51 = vld [vmem:[%s4537_s2 + $0xd0] sm:$0xf0] }
 0x6fe   : > { %v1357_v40 = vpop.f32.mrf.mxu3 }
 0x6ff   : > { %v1362_v53 = vadd.f32 %v1357_v40, %v1195_v44  ;;  %v3469_v44 = vor.u32 %v4133_v39, %v3468_v37  ;;  %v4151_v40 = vld [vmem:[%s4537_s2 + $0xd4] sm:$0xf0]  ;;  %v4145_v37 = vld [vmem:[%s4537_s2 + $0xac] sm:$0xf] }
 0x701   : > { %v1368_v22 = vadd.f32 %v4315_v52, %v1362_v53  ;;  %1702 = vmatpush.bf16.msrb.mxu2 %v3469_v44  ;;  %v3545_v53 = vor.u32 %v4142_v48, %v3542_v51  ;;  %v4136_v44 = vld [vmem:[%s4537_s2 + $0x5c] sm:$0xf0]  ;;  %v3500_v48 = vld [vmem:[%s4537_s2 + $0x28] sm:$0xf]  ;;  %v3502_v51 = vld [vmem:[%s4537_s2 + $0x68] sm:$0xf0] }
 0x703   : > { %v1370_v55 = vadd.f32 %v1368_v22, %v4569_v4  ;;  %v1384_v4 = vadd.f32 %v4354_v0, %v1383_v32  ;;  %1743 = vmatpush.bf16.msra.mxu1 %v3545_v53 }
 0x705   : > { %v1374_v57 = vsel %vm677_vm1, %v1370_v55, 0.0  ;;  %v4720_v12 = vsel %vm1385_vm2, %v4354_v0, %v1384_v4  ;;  %v3478_v0 = vld [vmem:[%s4537_s2 + $0x50] sm:$0xf0]  ;;  %v3485_v4 = vor.u32 %v4135_v2, %v3484_v1  ;;  %v4138_v1 = vld [vmem:[%s4537_s2 + $0x6c] sm:$0xf0] }
 0x706   : > { %1375 = vadd.xlane.f32.xlu1 %v1374_v57  ;;  %v1359_v58 = vpop.f32.mrf.mxu3 }
 0x707   : > { %v1363_v59 = vadd.f32 %v1359_v58, %v1196_v56  ;;  %v3476_v56 = vld [vmem:[%s4537_s2 + $0x10] sm:$0xf] }
 0x709   : > { %v1369_v60 = vadd.f32 %v4315_v52, %v1363_v59  ;;  %v3548_v52 = vld [vmem:[%s4537_s2 + $0x98] sm:$0xf] }
 0x70a   : > { %v3549_v22 = vor.u32 %v4151_v40, %v3548_v52  ;;  %v3493_v52 = vor.u32 %v4136_v44, %v3492_v43  ;;  %v3497_v40 = vor.u32 %v4128_v46, %v3494_v47  ;;  %v4174_v43 = vld [vmem:[%s4552_s0 + $0x90] sm:$0xff]  ;;  %v4181_v46 = vld [vmem:[%s4552_s0 + $0xc8] sm:$0xff]  ;;  %v4156_v47 = vld [vmem:[%s4552_s0] sm:$0xff] }
 0x70b   : > { %v1371_v61 = vadd.f32 %v1369_v60, %v4571_v5  ;;  %v4134_v60 = vld [vmem:[%s4537_s2 + $0x4c] sm:$0xf0] }
 0x70c   : > { %1757 = vmatpush.bf16.msra.mxu2 %v3549_v22  ;;  %v3477_v63 = vor.u32 %v4134_v60, %v3476_v56  ;;  %v3505_v22 = vor.u32 %v4129_v50, %v3502_v51  ;;  %v4146_v56 = vld [vmem:[%s4537_s2 + $0xb4] sm:$0xf]  ;;  %v4147_v60 = vld [vmem:[%s4537_s2 + $0xbc] sm:$0xf]  ;;  %v4172_v51 = vld [vmem:[%s4552_s0 + $0x80] sm:$0xff] }
 0x70d   : > { %v1377_v62 = vsel %vm677_vm1, %v1371_v61, 0.0  ;;  %v4182_v44 = vld [vmem:[%s4552_s0 + $0xd0] sm:$0xff]  ;;  %v4203_v50 = vld [vmem:[%s4552_s0 + $0x178] sm:$0xff] }
 0x70e   : > { %1378 = vadd.xlane.f32.xlu0 %v1377_v62  ;;  %1730 = vmatpush.bf16.msra.mxu0 %v3477_v63 }
 0x710   : > { %1758 = vmatpush.bf16.msra.mxu2 %v3485_v4  ;;  %v4130_v4 = vld [vmem:[%s4537_s2 + $0x34] sm:$0xf] }
 0x779   : > { %v1376_v3 = vpop.xlane.xlu1 %1375 }
 0x77a   : > { %v1387_v5 = vmul.f32 %v4720_v12, %v1376_v3  ;;  %v4127_v3 = vld [vmem:[%s4537_s2 + $0x1c] sm:$0xf] }
 0x77c   : > { %v4723_v6 = vsub.f32 %v1370_v55, %v1387_v5  ;;  %v3550_v55 = vld [vmem:[%s4537_s2 + $0xd8] sm:$0xf0] }
 0x77d   : > { %v3553_v59 = vor.u32 %v4143_v54, %v3550_v55  ;;  %v3486_v5 = vld [vmem:[%s4537_s2 + $0x58] sm:$0xf0]  ;;  %v3572_v54 = vld [vmem:[%s4537_s2 + $0xb0] sm:$0xf] }
 0x77e   : > { %v1391_v7 = vmul.f32 %v4723_v6, %v4723_v6  ;;  %v4154_v55 = vld [vmem:[%s4537_s2 + $0xec] sm:$0xf0] }
 0x77f   : > { %1771 = vmatpush.bf16.msrb.mxu3 %v3553_v59  ;;  %v4155_v59 = vld [vmem:[%s4537_s2 + $0xf4] sm:$0xf0] }
 0x780   : > { %v1393_v8 = vsel %vm677_vm1, %v1391_v7, 0.0 }
 0x781   : > { %1394 = vadd.xlane.f32.xlu2 %v1393_v8  ;;  %v1379_v9 = vpop.xlane.xlu0 %1378  ;;  %v3489_v8 = vor.u32 %v4127_v3, %v3486_v5  ;;  %v3510_v3 = vld [vmem:[%s4537_s2 + $0x70] sm:$0xf0]  ;;  %v3516_v5 = vld [vmem:[%s4537_s2 + $0x38] sm:$0xf] }
 0x782   : > { %v1388_v10 = vmul.f32 %v4720_v12, %v1379_v9 }
 0x783   : > { %1772 = vmatpush.bf16.msrb.mxu3 %v3489_v8  ;;  %v4131_v8 = vld [vmem:[%s4537_s2 + $0x3c] sm:$0xf] }
 0x784   : > { %v4729_v11 = vsub.f32 %v1371_v61, %v1388_v10  ;;  %v4126_v61 = vld [vmem:[%s4537_s2 + $0x14] sm:$0xf] }
 0x785   : > { %v3481_v32 = vor.u32 %v4126_v61, %v3478_v0  ;;  %v3582_v61 = vld [vmem:[%s4537_s2 + $0xf8] sm:$0xf0]  ;;  %v3508_v0 = vld [vmem:[%s4537_s2 + $0x30] sm:$0xf] }
 0x786   : > { %v1392_v13 = vmul.f32 %v4729_v11, %v4729_v11 }
 0x787   : > { %1744 = vmatpush.bf16.msra.mxu1 %v3481_v32  ;;  %v3585_v32 = vor.u32 %v4147_v60, %v3582_v61  ;;  %v4200_v60 = vld [vmem:[%s4552_s0 + $0x160] sm:$0xff]  ;;  %v4209_v61 = vld [vmem:[%s4552_s0 + $0x1a8] sm:$0xff] }
 0x788   : > { %v1396_v14 = vsel %vm677_vm1, %v1392_v13, 0.0 }
 0x789   : > { %1397 = vadd.xlane.f32.xlu1 %v1396_v14 }
 0x7f4   : > { %v1395_v24 = vpop.xlane.xlu2 %1394 }
 0x7f5   : > { %v1399_v28 = vmul.f32 %v1395_v24, %v4720_v12 }
 0x7f7   : > { %v4746_v34 = vadd.f32 1e-05, %v1399_v28 }
 0x7f9   : > { %4355 = vrsqrt.f32 %v4746_v34  ;;  %vm1409_vm11 = vweird.f32 %v4746_v34 }
 0x7fc   : > { %v1398_v45 = vpop.xlane.xlu1 %1397 }
 0x7fd   : > { %v1400_v49 = vmul.f32 %v1398_v45, %v4720_v12 }
 0x7ff   : > { %v4356_v57 = vpop.eup %4355  ;;  %v1402_v58 = vadd.f32 1e-05, %v1400_v49  ;;  %v4137_v49 = vld [vmem:[%s4537_s2 + $0x64] sm:$0xf0] }
 0x800   : > { %v1404_v62 = vmul.f32 %v4356_v57, %v4746_v34  ;;  %vm1410_vm3 = vweird.f32 %v4356_v57  ;;  %v3501_v53 = vor.u32 %v4137_v49, %v3500_v48  ;;  %v4164_v48 = vld [vmem:[%s4552_s0 + $0x40] sm:$0xff]  ;;  %v4195_v49 = vld [vmem:[%s4552_s0 + $0x138] sm:$0xff] }
 0x801   : > { %4357 = vrsqrt.f32 %v1402_v58  ;;  %vm1411_vm12 = vmor %vm1409_vm11, %vm1410_vm3  ;;  %vm1419_vm14 = vweird.f32 %v1402_v58 }
 0x802   : > { %v1405_v7 = vmul.f32 %v4356_v57, %v1404_v62  ;;  %v3573_v62 = vor.u32 %v4154_v55, %v3572_v54  ;;  %v4202_v54 = vld [vmem:[%s4552_s0 + $0x170] sm:$0xff] }
 0x803   : > { %v4210_v55 = vld [vmem:[%s4552_s0 + $0x1b0] sm:$0xff] }
 0x804   : > { %v1406_v9 = vmul.f32 0.5, %v1405_v7  ;;  %v4139_v7 = vld [vmem:[%s4537_s2 + $0x74] sm:$0xf0] }
 0x806   : > { %v1407_v10 = vsub.f32 1.5, %v1406_v9  ;;  %v3518_v9 = vld [vmem:[%s4537_s2 + $0x78] sm:$0xf0] }
 0x807   : > { %v4358_v13 = vpop.eup %4357 }
 0x808   : > { %v1408_v14 = vmul.f32 %v4356_v57, %v1407_v10  ;;  %v1414_v15 = vmul.f32 %v4358_v13, %v1402_v58  ;;  %vm1420_vm13 = vweird.f32 %v4358_v13  ;;  %v3580_v58 = vld [vmem:[%s4537_s2 + $0xb8] sm:$0xf]  ;;  %v3509_v10 = vor.u32 %v4138_v1, %v3508_v0  ;;  %v4208_v1 = vld [vmem:[%s4552_s0 + $0x1a0] sm:$0xff] }
 0x809   : > { %vm1421_vm15 = vmor %vm1419_vm14, %vm1420_vm13  ;;  %v3581_v2 = vor.u32 %v4155_v59, %v3580_v58  ;;  %v4201_v58 = vld [vmem:[%s4552_s0 + $0x168] sm:$0xff]  ;;  %v4192_v59 = vld [vmem:[%s4552_s0 + $0x120] sm:$0xff] }
 0x80a   : > { %v1415_v16 = vmul.f32 %v4358_v13, %v1414_v15  ;;  %v1412_v18 = vsel %vm1411_vm12, %v4356_v57, %v1408_v14  ;;  %v3574_v57 = vld [vmem:[%s4537_s2 + $0xf0] sm:$0xf0]  ;;  %v3517_v14 = vor.u32 %v4139_v7, %v3516_v5  ;;  %v3521_v15 = vor.u32 %v4131_v8, %v3518_v9  ;;  %v4199_v0 = vld [vmem:[%s4552_s0 + $0x158] sm:$0xff]  ;;  %v4189_v7 = vld [vmem:[%s4552_s0 + $0x108] sm:$0xff] }
 0x80b   : > { %v1423_v23 = vmul.f32 %v1412_v18, %v4723_v6  ;;  %v4152_v6 = vld [vmem:[%s4537_s2 + $0xdc] sm:$0xf0]  ;;  %v3577_v63 = vor.u32 %v4146_v56, %v3574_v57  ;;  %v4171_v18 = vld [vmem:[%s4552_s0 + $0x78] sm:$0xff]  ;;  %v4218_v56 = vld [vmem:[%s4552_s0 + $0x1f0] sm:$0xff] }
 0x80c   : > { %v1416_v19 = vmul.f32 0.5, %v1415_v16  ;;  %v3557_v39 = vor.u32 %v4152_v6, %v3556_v29  ;;  %v4163_v16 = vld [vmem:[%s4552_s0 + $0x38] sm:$0xff]  ;;  %v4160_v29 = vld [vmem:[%s4552_s0 + $0x20] sm:$0xff]  ;;  %v4193_v57 = vld [vmem:[%s4552_s0 + $0x128] sm:$0xff] }
 0x80d   : > { %v1428_v26 = vmul.f32 %v4316_v21, %v1423_v23  ;;  %v4170_v23 = vld [vmem:[%s4552_s0 + $0x70] sm:$0xff]  ;;  %v4168_v6 = vld [vmem:[%s4552_s0 + $0x60] sm:$0xff]  ;;  %v4215_v5 = vld [vmem:[%s4552_s0 + $0x1d8] sm:$0xff] }
 0x80e   : > { %v1417_v20 = vsub.f32 1.5, %v1416_v19  ;;  %v4179_v19 = vld [vmem:[%s4552_s0 + $0xb8] sm:$0xff]  ;;  %v4197_v8 = vld [vmem:[%s4552_s0 + $0x148] sm:$0xff]  ;;  %v4206_v9 = vld [vmem:[%s4552_s0 + $0x190] sm:$0xff] }
 0x80f   : > { %v4790_v34 = vadd.f32 %v4317_v17, %v1428_v26  ;;  %v4169_v26 = vld [vmem:[%s4552_s0 + $0x68] sm:$0xff] }
 0x810   : > { %v1418_v24 = vmul.f32 %v4358_v13, %v1417_v20  ;;  %v4187_v20 = vld [vmem:[%s4552_s0 + $0xf8] sm:$0xff] }
 0x812   : > { %v1422_v25 = vsel %vm1421_vm15, %v4358_v13, %v1418_v24  ;;  %v3513_v13 = vor.u32 %v4130_v4, %v3510_v3  ;;  %v4178_v24 = vld [vmem:[%s4552_s0 + $0xb0] sm:$0xff]  ;;  %v4207_v3 = vld [vmem:[%s4552_s0 + $0x198] sm:$0xff] }
 0x813   : > { %v1424_v27 = vmul.f32 %v1422_v25, %v4729_v11  ;;  %v3566_v11 = vld [vmem:[%s4537_s2 + $0xe8] sm:$0xf0]  ;;  %v4186_v25 = vld [vmem:[%s4552_s0 + $0xf0] sm:$0xff] }
 0x814   : > { %v3569_v45 = vor.u32 %v4145_v37, %v3566_v11  ;;  %v4175_v37 = vld [vmem:[%s4552_s0 + $0x98] sm:$0xff]  ;;  %v4198_v4 = vld [vmem:[%s4552_s0 + $0x150] sm:$0xff] }
 0x815   : > { %v1429_v28 = vmul.f32 %v4316_v21, %v1424_v27  ;;  %v4162_v21 = vld [vmem:[%s4552_s0 + $0x30] sm:$0xff]  ;;  %v4177_v27 = vld [vmem:[%s4552_s0 + $0xa8] sm:$0xff]  ;;  %v4183_v11 = vld [vmem:[%s4552_s0 + $0xd8] sm:$0xff] }
 0x817   : > { %v4792_v35 = vadd.f32 %v4317_v17, %v1429_v28  ;;  %v4161_v17 = vld [vmem:[%s4552_s0 + $0x28] sm:$0xff] }
 0x818   : > { %v4185_v28 = vld [vmem:[%s4552_s0 + $0xe8] sm:$0xff] }
 0x819   : > { %v4799_v38 = vpack.c.bf16 %v4792_v35, %v4790_v34 }
 0x81b   : > { %3586 = vmatmul.msk.bf16.vlgmr.msrb.gmra.mxu0 %vm677_vm1, %v4799_v38  ;;  %3587 = vmatmul.msk.bf16.vlgmr.msrb.gmra.mxu1 %vm677_vm1, %v4799_v38 }
 0x81c   : > { %3588 = vmatmul.msk.bf16.vlgmr.msrb.gmra.mxu2 %vm677_vm1, %v4799_v38  ;;  %3589 = vmatmul.msk.bf16.vlgmr.msra.gmra.mxu3 %vm677_vm1, %v4799_v38 }
 0x81d   : > { %1785 = vmatpush.bf16.msrb.mxu0 %v3557_v39  ;;  %1799 = vmatpush.bf16.msrb.mxu1 %v3561_v41  ;;  %v4158_v39 = vld [vmem:[%s4552_s0 + $0x10] sm:$0xff] }
 0x81e   : > { %1813 = vmatpush.bf16.msrb.mxu2 %v3565_v42  ;;  %1827 = vmatpush.bf16.msra.mxu3 %v3569_v45  ;;  %v4166_v41 = vld [vmem:[%s4552_s0 + $0x50] sm:$0xff]  ;;  %v4157_v42 = vld [vmem:[%s4552_s0 + $0x8] sm:$0xff] }
 0x81f   : > { %v4173_v45 = vld [vmem:[%s4552_s0 + $0x88] sm:$0xff] }
 0x821   : > { %1786 = vmatpush.bf16.msrb.mxu0 %v3493_v52  ;;  %1800 = vmatpush.bf16.msrb.mxu1 %v3497_v40  ;;  %v4180_v52 = vld [vmem:[%s4552_s0 + $0xc0] sm:$0xff]  ;;  %v4211_v40 = vld [vmem:[%s4552_s0 + $0x1b8] sm:$0xff] }
 0x822   : > { %1814 = vmatpush.bf16.msrb.mxu2 %v3501_v53  ;;  %1828 = vmatpush.bf16.msra.mxu3 %v3505_v22  ;;  %v4219_v53 = vld [vmem:[%s4552_s0 + $0x1f8] sm:$0xff]  ;;  %v4194_v22 = vld [vmem:[%s4552_s0 + $0x130] sm:$0xff] }
 0x82b   : > { %3590 = vmatmul.msk.bf16.vlgmr.msra.gmra.mxu0 %vm677_vm1, %v4799_v38  ;;  %3591 = vmatmul.msk.bf16.vlgmr.msra.gmra.mxu1 %vm677_vm1, %v4799_v38 }
 0x82c   : > { %3592 = vmatmul.msk.bf16.vlgmr.msra.gmra.mxu2 %vm677_vm1, %v4799_v38  ;;  %3593 = vmatmul.msk.bf16.vlgmr.msrb.gmra.mxu3 %vm677_vm1, %v4799_v38 }
 0x82d   : > { %1841 = vmatpush.bf16.msra.mxu0 %v3573_v62  ;;  %1855 = vmatpush.bf16.msra.mxu1 %v3577_v63  ;;  %v4217_v62 = vld [vmem:[%s4552_s0 + $0x1e8] sm:$0xff]  ;;  %v4191_v63 = vld [vmem:[%s4552_s0 + $0x118] sm:$0xff] }
 0x82e   : > { %1869 = vmatpush.bf16.msra.mxu2 %v3581_v2  ;;  %1883 = vmatpush.bf16.msrb.mxu3 %v3585_v32  ;;  %v4216_v2 = vld [vmem:[%s4552_s0 + $0x1e0] sm:$0xff]  ;;  %v4190_v32 = vld [vmem:[%s4552_s0 + $0x110] sm:$0xff] }
 0x831   : > { %1842 = vmatpush.bf16.msra.mxu0 %v3509_v10  ;;  %1856 = vmatpush.bf16.msra.mxu1 %v3513_v13  ;;  %v4214_v10 = vld [vmem:[%s4552_s0 + $0x1d0] sm:$0xff]  ;;  %v4188_v13 = vld [vmem:[%s4552_s0 + $0x100] sm:$0xff] }
 0x832   : > { %1870 = vmatpush.bf16.msra.mxu2 %v3517_v14  ;;  %1884 = vmatpush.bf16.msrb.mxu3 %v3521_v15  ;;  %v4196_v14 = vld [vmem:[%s4552_s0 + $0x140] sm:$0xff]  ;;  %v4205_v15 = vld [vmem:[%s4552_s0 + $0x188] sm:$0xff] }
 0x83b   : > { %3594 = vmatmul.msk.bf16.vlgmr.msrb.gmra.mxu0 %vm677_vm1, %v4799_v38  ;;  %3595 = vmatmul.msk.bf16.vlgmr.msrb.gmra.mxu1 %vm677_vm1, %v4799_v38 }
 0x83c   : > { %3596 = vmatmul.msk.bf16.vlgmr.msrb.gmra.mxu2 %vm677_vm1, %v4799_v38  ;;  %3597 = vmatmul.msk.bf16.vlgmr.msra.gmra.mxu3 %vm677_vm1, %v4799_v38 }
 0x83d   : > { %2967 = vmatpush.bf16.msrb.mxu0 %v4163_v16  ;;  %2981 = vmatpush.bf16.msrb.mxu1 %v4171_v18  ;;  %v4213_v16 = vld [vmem:[%s4552_s0 + $0x1c8] sm:$0xff]  ;;  %v4204_v18 = vld [vmem:[%s4552_s0 + $0x180] sm:$0xff] }
 0x83e   : > { %2995 = vmatpush.bf16.msrb.mxu2 %v4179_v19  ;;  %3009 = vmatpush.bf16.msra.mxu3 %v4187_v20  ;;  %v4212_v19 = vld [vmem:[%s4552_s0 + $0x1c0] sm:$0xff] }
 0x83f   : > { %v4922_v20 = vld [vmem:[%s4542_s4] sm:$0xff] }
 0x841   : > { %2968 = vmatpush.bf16.msrb.mxu0 %v4162_v21  ;;  %2982 = vmatpush.bf16.msrb.mxu1 %v4170_v23 }
 0x842   : > { %2996 = vmatpush.bf16.msrb.mxu2 %v4178_v24  ;;  %3010 = vmatpush.bf16.msra.mxu3 %v4186_v25  ;;  %v1472_v24 = vperm.slane %v4922_v20, 0  ;;  %v1473_v25 = vperm.slane %v4922_v20, 1 }
 0x845   : > { %2969 = vmatpush.bf16.msrb.mxu0 %v4161_v17  ;;  %2983 = vmatpush.bf16.msrb.mxu1 %v4169_v26 }
 0x846   : > { %2997 = vmatpush.bf16.msrb.mxu2 %v4177_v27  ;;  %3011 = vmatpush.bf16.msra.mxu3 %v4185_v28 }
 0x849   : > { %2970 = vmatpush.bf16.msrb.mxu0 %v4160_v29  ;;  %2984 = vmatpush.bf16.msrb.mxu1 %v4168_v6 }
 0x84a   : > { %2998 = vmatpush.bf16.msrb.mxu2 %v4176_v30  ;;  %3012 = vmatpush.bf16.msra.mxu3 %v4184_v31 }
 0x84b   : > { %3598 = vmatmul.msk.bf16.vlgmr.msra.gmra.mxu0 %vm677_vm1, %v4799_v38  ;;  %3599 = vmatmul.msk.bf16.vlgmr.msra.gmra.mxu1 %vm677_vm1, %v4799_v38 }
 0x84c   : > { %3600 = vmatmul.msk.bf16.vlgmr.msra.gmra.mxu2 %vm677_vm1, %v4799_v38  ;;  %3601 = vmatmul.msk.bf16.vlgmr.msrb.gmra.mxu3 %vm677_vm1, %v4799_v38  ;;  %v4165_v38 = vld [vmem:[%s4552_s0 + $0x48] sm:$0xff] }
 0x84d   : > { %2971 = vmatpush.bf16.msrb.mxu0 %v4159_v33  ;;  %2985 = vmatpush.bf16.msrb.mxu1 %v4167_v36  ;;  %v1474_v33 = vperm.slane %v4922_v20, 2  ;;  %v1475_v36 = vperm.slane %v4922_v20, 3 }
 0x84e   : > { %2999 = vmatpush.bf16.msrb.mxu2 %v4175_v37  ;;  %3013 = vmatpush.bf16.msra.mxu3 %v4183_v11 }
 0x851   : > { %2972 = vmatpush.bf16.msrb.mxu0 %v4158_v39  ;;  %2986 = vmatpush.bf16.msrb.mxu1 %v4166_v41 }
 0x852   : > { %3000 = vmatpush.bf16.msrb.mxu2 %v4174_v43  ;;  %3014 = vmatpush.bf16.msra.mxu3 %v4182_v44  ;;  %v4227_v43 = vld [vmem:[%s4552_s0 + $0x238] sm:$0xff] }
 0x853   : > { %v4235_v44 = vld [vmem:[%s4552_s0 + $0x278] sm:$0xff] }
 0x855   : > { %2973 = vmatpush.bf16.msrb.mxu0 %v4157_v42  ;;  %2987 = vmatpush.bf16.msrb.mxu1 %v4165_v38 }
 0x856   : > { %3001 = vmatpush.bf16.msrb.mxu2 %v4173_v45  ;;  %3015 = vmatpush.bf16.msra.mxu3 %v4181_v46 }
 0x859   : > { %2974 = vmatpush.bf16.msrb.mxu0 %v4156_v47  ;;  %2988 = vmatpush.bf16.msrb.mxu1 %v4164_v48 }
 0x85a   : > { %3002 = vmatpush.bf16.msrb.mxu2 %v4172_v51  ;;  %3016 = vmatpush.bf16.msra.mxu3 %v4180_v52 }
 0x85d   : > { %3023 = vmatpush.bf16.msra.mxu0 %v4195_v49  ;;  %3037 = vmatpush.bf16.msra.mxu1 %v4203_v50 }
 0x85e   : > { %3051 = vmatpush.bf16.msra.mxu2 %v4211_v40  ;;  %3065 = vmatpush.bf16.msrb.mxu3 %v4219_v53  ;;  %v4226_v40 = vld [vmem:[%s4552_s0 + $0x230] sm:$0xff] }
 0x85f   : > { %v4234_v53 = vld [vmem:[%s4552_s0 + $0x270] sm:$0xff] }
 0x861   : > { %3024 = vmatpush.bf16.msra.mxu0 %v4194_v22  ;;  %3038 = vmatpush.bf16.msra.mxu1 %v4202_v54 }
 0x862   : > { %3052 = vmatpush.bf16.msra.mxu2 %v4210_v55  ;;  %3066 = vmatpush.bf16.msrb.mxu3 %v4218_v56 }
 0x865   : > { %3025 = vmatpush.bf16.msra.mxu0 %v4193_v57  ;;  %3039 = vmatpush.bf16.msra.mxu1 %v4201_v58  ;;  %v1476_v57 = vperm.slane %v4922_v20, 4  ;;  %v1477_v58 = vperm.slane %v4922_v20, 5 }
 0x866   : > { %3053 = vmatpush.bf16.msra.mxu2 %v4209_v61  ;;  %3067 = vmatpush.bf16.msrb.mxu3 %v4217_v62 }
 0x869   : > { %3026 = vmatpush.bf16.msra.mxu0 %v4192_v59  ;;  %3040 = vmatpush.bf16.msra.mxu1 %v4200_v60  ;;  %v4243_v59 = vld [vmem:[%s4552_s0 + $0x2b8] sm:$0xff] }
 0x86a   : > { %3054 = vmatpush.bf16.msra.mxu2 %v4208_v1  ;;  %3068 = vmatpush.bf16.msrb.mxu3 %v4216_v2  ;;  %v4251_v60 = vld [vmem:[%s4552_s0 + $0x2f8] sm:$0xff] }
 0x86d   : > { %3027 = vmatpush.bf16.msra.mxu0 %v4191_v63  ;;  %3041 = vmatpush.bf16.msra.mxu1 %v4199_v0  ;;  %v4225_v63 = vld [vmem:[%s4552_s0 + $0x228] sm:$0xff] }
 0x86e   : > { %3055 = vmatpush.bf16.msra.mxu2 %v4207_v3  ;;  %3069 = vmatpush.bf16.msrb.mxu3 %v4215_v5  ;;  %v4233_v0 = vld [vmem:[%s4552_s0 + $0x268] sm:$0xff]  ;;  %v4242_v3 = vld [vmem:[%s4552_s0 + $0x2b0] sm:$0xff] }
 0x86f   : > { %v4250_v5 = vld [vmem:[%s4552_s0 + $0x2f0] sm:$0xff] }
 0x871   : > { %3028 = vmatpush.bf16.msra.mxu0 %v4190_v32  ;;  %3042 = vmatpush.bf16.msra.mxu1 %v4198_v4 }
 0x872   : > { %3056 = vmatpush.bf16.msra.mxu2 %v4206_v9  ;;  %3070 = vmatpush.bf16.msrb.mxu3 %v4214_v10  ;;  %v4224_v9 = vld [vmem:[%s4552_s0 + $0x220] sm:$0xff] }
 0x873   : > { %v4232_v10 = vld [vmem:[%s4552_s0 + $0x260] sm:$0xff] }
 0x875   : > { %3029 = vmatpush.bf16.msra.mxu0 %v4189_v7  ;;  %3043 = vmatpush.bf16.msra.mxu1 %v4197_v8 }
 0x876   : > { %3057 = vmatpush.bf16.msra.mxu2 %v4205_v15  ;;  %3071 = vmatpush.bf16.msrb.mxu3 %v4213_v16  ;;  %v1478_v15 = vperm.slane %v4922_v20, 6  ;;  %v1479_v16 = vperm.slane %v4922_v20, 7 }
 0x879   : > { %3030 = vmatpush.bf16.msra.mxu0 %v4188_v13  ;;  %3044 = vmatpush.bf16.msra.mxu1 %v4196_v14 }
 0x87a   : > { %3058 = vmatpush.bf16.msra.mxu2 %v4204_v18  ;;  %3072 = vmatpush.bf16.msrb.mxu3 %v4212_v19 }
 0x898   : > { %v1676_v21 = vpop.f32.mrf.mxu0  ;;  %v1690_v23 = vpop.f32.mrf.mxu1 }
 0x899   : > { %v1677_v17 = vadd.f32 %v1676_v21, %v1472_v24  ;;  %v1691_v26 = vadd.f32 %v1690_v23, %v1473_v25 }
 0x89b   : > { %v1891_v37 = vmax.f32 %v1677_v17, 0.0  ;;  %v1892_v11 = vmax.f32 %v1691_v26, 0.0 }
 0x89f   : > { %v1704_v27 = vpop.f32.mrf.mxu2  ;;  %v1718_v28 = vpop.f32.mrf.mxu3 }
 0x8a0   : > { %v1678_v29 = vpop.f32.mrf.mxu0  ;;  %v1692_v6 = vpop.f32.mrf.mxu1  ;;  %v1705_v45 = vadd.f32 %v1704_v27, %v1474_v33  ;;  %v1719_v46 = vadd.f32 %v1718_v28, %v1475_v36  ;;  %v4223_v27 = vld [vmem:[%s4552_s0 + $0x218] sm:$0xff] }
 0x8a1   : > { %v1679_v30 = vadd.f32 %v1678_v29, %v1472_v24  ;;  %v1693_v31 = vadd.f32 %v1692_v6, %v1473_v25  ;;  %v4241_v24 = vld [vmem:[%s4552_s0 + $0x2a8] sm:$0xff]  ;;  %v4231_v28 = vld [vmem:[%s4552_s0 + $0x258] sm:$0xff] }
 0x8a2   : > { %v1893_v22 = vmax.f32 %v1705_v45, 0.0  ;;  %v1894_v54 = vmax.f32 %v1719_v46, 0.0  ;;  %v4249_v25 = vld [vmem:[%s4552_s0 + $0x2e8] sm:$0xff] }
 0x8a3   : > { %v1907_v39 = vmax.f32 %v1679_v30, 0.0  ;;  %v1908_v41 = vmax.f32 %v1693_v31, 0.0  ;;  %v4240_v31 = vld [vmem:[%s4552_s0 + $0x2a0] sm:$0xff] }
 0x8a5   : > { %v1923_v42 = vpack.c.bf16 %v1907_v39, %v1891_v37  ;;  %v1924_v38 = vpack.c.bf16 %v1908_v41, %v1892_v11  ;;  %v4951_v11 = vld [vmem:[%s4542_s4 + $0x8] sm:$0xff] }
 0x8a7   : > { %v1706_v47 = vpop.f32.mrf.mxu2  ;;  %v1720_v48 = vpop.f32.mrf.mxu3  ;;  %2975 = vmatmul.bf16.vlgmr.msrb.gmra.mxu0 %v1923_v42  ;;  %2989 = vmatmul.bf16.vlgmr.msrb.gmra.mxu1 %v1924_v38 }
 0x8a8   : > { %v1707_v49 = vadd.f32 %v1706_v47, %v1474_v33  ;;  %v1721_v50 = vadd.f32 %v1720_v48, %v1475_v36  ;;  %3079 = vmatpush.bf16.msrb.mxu0 %v4227_v43  ;;  %3093 = vmatpush.bf16.msrb.mxu1 %v4235_v44  ;;  %v1732_v51 = vpop.f32.mrf.mxu0  ;;  %v1746_v52 = vpop.f32.mrf.mxu1  ;;  %v4248_v33 = vld [vmem:[%s4552_s0 + $0x2e0] sm:$0xff]  ;;  %v4222_v43 = vld [vmem:[%s4552_s0 + $0x210] sm:$0xff]  ;;  %v1480_v47 = vperm.slane %v4951_v11, 0  ;;  %v1481_v48 = vperm.slane %v4951_v11, 1 }
 0x8a9   : > { %v1733_v1 = vadd.f32 %v1732_v51, %v1476_v57  ;;  %v1747_v2 = vadd.f32 %v1746_v52, %v1477_v58  ;;  %v4230_v44 = vld [vmem:[%s4552_s0 + $0x250] sm:$0xff] }
 0x8aa   : > { %v1909_v55 = vmax.f32 %v1707_v49, 0.0  ;;  %v1910_v56 = vmax.f32 %v1721_v50, 0.0  ;;  %v4239_v49 = vld [vmem:[%s4552_s0 + $0x298] sm:$0xff] }
 0x8ab   : > { %v1895_v18 = vmax.f32 %v1733_v1, 0.0  ;;  %v1896_v19 = vmax.f32 %v1747_v2, 0.0  ;;  %v4247_v50 = vld [vmem:[%s4552_s0 + $0x2d8] sm:$0xff]  ;;  %v1482_v1 = vperm.slane %v4951_v11, 2  ;;  %v1483_v2 = vperm.slane %v4951_v11, 3 }
 0x8ac   : > { %v1925_v61 = vpack.c.bf16 %v1909_v55, %v1893_v22  ;;  %v1926_v62 = vpack.c.bf16 %v1910_v56, %v1894_v54  ;;  %3080 = vmatpush.bf16.msrb.mxu0 %v4226_v40  ;;  %3094 = vmatpush.bf16.msrb.mxu1 %v4234_v53  ;;  %v4221_v40 = vld [vmem:[%s4552_s0 + $0x208] sm:$0xff] }
 0x8ad   : > { %v4229_v53 = vld [vmem:[%s4552_s0 + $0x248] sm:$0xff] }
 0x8ae   : > { %3003 = vmatmul.bf16.vlgmr.msrb.gmra.mxu2 %v1925_v61  ;;  %3017 = vmatmul.bf16.vlgmr.msra.gmra.mxu3 %v1926_v62 }
 0x8af   : > { %3107 = vmatpush.bf16.msrb.mxu2 %v4243_v59  ;;  %3121 = vmatpush.bf16.msra.mxu3 %v4251_v60  ;;  %v1760_v32 = vpop.f32.mrf.mxu2  ;;  %v1774_v4 = vpop.f32.mrf.mxu3 }
 0x8b0   : > { %3081 = vmatpush.bf16.msrb.mxu0 %v4225_v63  ;;  %3095 = vmatpush.bf16.msrb.mxu1 %v4233_v0  ;;  %v1734_v7 = vpop.f32.mrf.mxu0  ;;  %v1748_v8 = vpop.f32.mrf.mxu1  ;;  %v1761_v29 = vadd.f32 %v1760_v32, %v1478_v15  ;;  %v1775_v6 = vadd.f32 %v1774_v4, %v1479_v16  ;;  %v4220_v63 = vld [vmem:[%s4552_s0 + $0x200] sm:$0xff]  ;;  %v4259_v32 = vld [vmem:[%s4552_s0 + $0x338] sm:$0xff] }
 0x8b1   : > { %v1735_v13 = vadd.f32 %v1734_v7, %v1476_v57  ;;  %v1749_v14 = vadd.f32 %v1748_v8, %v1477_v58  ;;  %v4238_v57 = vld [vmem:[%s4552_s0 + $0x290] sm:$0xff]  ;;  %v4228_v0 = vld [vmem:[%s4552_s0 + $0x240] sm:$0xff]  ;;  %v4267_v4 = vld [vmem:[%s4552_s0 + $0x378] sm:$0xff] }
 0x8b2   : > { %v1897_v42 = vmax.f32 %v1761_v29, 0.0  ;;  %v1898_v38 = vmax.f32 %v1775_v6, 0.0  ;;  %v4246_v58 = vld [vmem:[%s4552_s0 + $0x2d0] sm:$0xff] }
 0x8b3   : > { %v1911_v21 = vmax.f32 %v1735_v13, 0.0  ;;  %v1912_v23 = vmax.f32 %v1749_v14, 0.0  ;;  %3108 = vmatpush.bf16.msrb.mxu2 %v4242_v3  ;;  %3122 = vmatpush.bf16.msra.mxu3 %v4250_v5 }
 0x8b4   : > { %3082 = vmatpush.bf16.msrb.mxu0 %v4224_v9  ;;  %3096 = vmatpush.bf16.msrb.mxu1 %v4232_v10  ;;  %v4237_v9 = vld [vmem:[%s4552_s0 + $0x288] sm:$0xff] }
 0x8b5   : > { %v1927_v17 = vpack.c.bf16 %v1911_v21, %v1895_v18  ;;  %v1928_v26 = vpack.c.bf16 %v1912_v23, %v1896_v19  ;;  %v4245_v10 = vld [vmem:[%s4552_s0 + $0x2c8] sm:$0xff]  ;;  %v4258_v18 = vld [vmem:[%s4552_s0 + $0x330] sm:$0xff] }
 0x8b6   : > { %v4266_v19 = vld [vmem:[%s4552_s0 + $0x370] sm:$0xff] }
 0x8b7   : > { %3109 = vmatpush.bf16.msrb.mxu2 %v4241_v24  ;;  %3123 = vmatpush.bf16.msra.mxu3 %v4249_v25  ;;  %v1762_v20 = vpop.f32.mrf.mxu2  ;;  %v1776_v30 = vpop.f32.mrf.mxu3  ;;  %v4236_v24 = vld [vmem:[%s4552_s0 + $0x280] sm:$0xff] }
 0x8b8   : > { %v1763_v36 = vadd.f32 %v1762_v20, %v1478_v15  ;;  %v1777_v37 = vadd.f32 %v1776_v30, %v1479_v16  ;;  %3031 = vmatmul.bf16.vlgmr.msra.gmra.mxu0 %v1927_v17  ;;  %3045 = vmatmul.bf16.vlgmr.msra.gmra.mxu1 %v1928_v26  ;;  %v1788_v39 = vpop.f32.mrf.mxu0  ;;  %v1802_v41 = vpop.f32.mrf.mxu1  ;;  %v4244_v25 = vld [vmem:[%s4552_s0 + $0x2c0] sm:$0xff] }
 0x8b9   : > { %3083 = vmatpush.bf16.msrb.mxu0 %v4223_v27  ;;  %3097 = vmatpush.bf16.msrb.mxu1 %v4231_v28  ;;  %v1789_v22 = vadd.f32 %v1788_v39, %v1480_v47  ;;  %v1803_v54 = vadd.f32 %v1802_v41, %v1481_v48  ;;  %v4275_v27 = vld [vmem:[%s4552_s0 + $0x3b8] sm:$0xff]  ;;  %v4274_v39 = vld [vmem:[%s4552_s0 + $0x3b0] sm:$0xff] }
 0x8ba   : > { %v1913_v45 = vmax.f32 %v1763_v36, 0.0  ;;  %v1914_v46 = vmax.f32 %v1777_v37, 0.0  ;;  %v4283_v28 = vld [vmem:[%s4552_s0 + $0x3f8] sm:$0xff]  ;;  %v4282_v41 = vld [vmem:[%s4552_s0 + $0x3f0] sm:$0xff] }
 0x8bb   : > { %3110 = vmatpush.bf16.msrb.mxu2 %v4240_v31  ;;  %3124 = vmatpush.bf16.msra.mxu3 %v4248_v33  ;;  %v1899_v3 = vmax.f32 %v1789_v22, 0.0  ;;  %v1900_v5 = vmax.f32 %v1803_v54, 0.0  ;;  %v4257_v31 = vld [vmem:[%s4552_s0 + $0x328] sm:$0xff] }
 0x8bc   : > { %v1929_v51 = vpack.c.bf16 %v1913_v45, %v1897_v42  ;;  %v1930_v52 = vpack.c.bf16 %v1914_v46, %v1898_v38  ;;  %v4265_v33 = vld [vmem:[%s4552_s0 + $0x368] sm:$0xff]  ;;  %v4256_v42 = vld [vmem:[%s4552_s0 + $0x320] sm:$0xff] }
 0x8bd   : > { %3084 = vmatpush.bf16.msrb.mxu0 %v4222_v43  ;;  %3098 = vmatpush.bf16.msrb.mxu1 %v4230_v44  ;;  %v4264_v38 = vld [vmem:[%s4552_s0 + $0x360] sm:$0xff]  ;;  %v4273_v45 = vld [vmem:[%s4552_s0 + $0x3a8] sm:$0xff] }
 0x8be   : > { %3059 = vmatmul.bf16.vlgmr.msra.gmra.mxu2 %v1929_v51  ;;  %3073 = vmatmul.bf16.vlgmr.msrb.gmra.mxu3 %v1930_v52  ;;  %v4281_v46 = vld [vmem:[%s4552_s0 + $0x3e8] sm:$0xff]  ;;  %v4272_v51 = vld [vmem:[%s4552_s0 + $0x3a0] sm:$0xff] }
 0x8bf   : > { %3111 = vmatpush.bf16.msrb.mxu2 %v4239_v49  ;;  %3125 = vmatpush.bf16.msra.mxu3 %v4247_v50  ;;  %v1816_v55 = vpop.f32.mrf.mxu2  ;;  %v1830_v56 = vpop.f32.mrf.mxu3  ;;  %v4280_v52 = vld [vmem:[%s4552_s0 + $0x3e0] sm:$0xff] }
 0x8c0   : > { %v1790_v59 = vpop.f32.mrf.mxu0  ;;  %v1804_v60 = vpop.f32.mrf.mxu1  ;;  %v1817_v15 = vadd.f32 %v1816_v55, %v1482_v1  ;;  %v1831_v16 = vadd.f32 %v1830_v56, %v1483_v2  ;;  %v4271_v55 = vld [vmem:[%s4552_s0 + $0x398] sm:$0xff] }
 0x8c1   : > { %3085 = vmatpush.bf16.msrb.mxu0 %v4221_v40  ;;  %3099 = vmatpush.bf16.msrb.mxu1 %v4229_v53  ;;  %v1791_v61 = vadd.f32 %v1790_v59, %v1480_v47  ;;  %v1805_v62 = vadd.f32 %v1804_v60, %v1481_v48  ;;  %v4255_v47 = vld [vmem:[%s4552_s0 + $0x318] sm:$0xff]  ;;  %v4254_v40 = vld [vmem:[%s4552_s0 + $0x310] sm:$0xff]  ;;  %v4253_v59 = vld [vmem:[%s4552_s0 + $0x308] sm:$0xff] }
 0x8c2   : > { %v1901_v29 = vmax.f32 %v1817_v15, 0.0  ;;  %v1902_v6 = vmax.f32 %v1831_v16, 0.0  ;;  %v4263_v48 = vld [vmem:[%s4552_s0 + $0x358] sm:$0xff]  ;;  %v4262_v53 = vld [vmem:[%s4552_s0 + $0x350] sm:$0xff]  ;;  %v4261_v60 = vld [vmem:[%s4552_s0 + $0x348] sm:$0xff] }
 0x8c3   : > { %v1915_v7 = vmax.f32 %v1791_v61, 0.0  ;;  %v1916_v8 = vmax.f32 %v1805_v62, 0.0  ;;  %3112 = vmatpush.bf16.msrb.mxu2 %v4238_v57  ;;  %3126 = vmatpush.bf16.msra.mxu3 %v4246_v58  ;;  %v4279_v56 = vld [vmem:[%s4552_s0 + $0x3d8] sm:$0xff]  ;;  %v1484_v57 = vperm.slane %v4951_v11, 4  ;;  %v1485_v58 = vperm.slane %v4951_v11, 5 }
 0x8c5   : > { %v1931_v13 = vpack.c.bf16 %v1915_v7, %v1899_v3  ;;  %v1932_v14 = vpack.c.bf16 %v1916_v8, %v1900_v5  ;;  %3086 = vmatpush.bf16.msrb.mxu0 %v4220_v63  ;;  %3100 = vmatpush.bf16.msrb.mxu1 %v4228_v0  ;;  %v4270_v63 = vld [vmem:[%s4552_s0 + $0x390] sm:$0xff]  ;;  %v4252_v3 = vld [vmem:[%s4552_s0 + $0x300] sm:$0xff]  ;;  %v1486_v7 = vperm.slane %v4951_v11, 6  ;;  %v1487_v8 = vperm.slane %v4951_v11, 7 }
 0x8c6   : > { %v4278_v0 = vld [vmem:[%s4552_s0 + $0x3d0] sm:$0xff]  ;;  %v4260_v5 = vld [vmem:[%s4552_s0 + $0x340] sm:$0xff] }
 0x8c7   : > { %3113 = vmatpush.bf16.msrb.mxu2 %v4237_v9  ;;  %3127 = vmatpush.bf16.msra.mxu3 %v4245_v10  ;;  %v1818_v21 = vpop.f32.mrf.mxu2  ;;  %v1832_v23 = vpop.f32.mrf.mxu3  ;;  %v4268_v11 = vld [vmem:[%s4552_s0 + $0x380] sm:$0xff] }
 0x8c8   : > { %v1819_v17 = vadd.f32 %v1818_v21, %v1482_v1  ;;  %v1833_v26 = vadd.f32 %v1832_v23, %v1483_v2  ;;  %3087 = vmatmul.bf16.vlgmr.msrb.gmra.mxu0 %v1931_v13  ;;  %3101 = vmatmul.bf16.vlgmr.msrb.gmra.mxu1 %v1932_v14  ;;  %v1844_v43 = vpop.f32.mrf.mxu0  ;;  %v1858_v44 = vpop.f32.mrf.mxu1  ;;  %v4269_v13 = vld [vmem:[%s4552_s0 + $0x388] sm:$0xff] }
 0x8c9   : > { %3135 = vmatpush.bf16.msra.mxu0 %v4259_v32  ;;  %3149 = vmatpush.bf16.msra.mxu1 %v4267_v4  ;;  %v1845_v1 = vadd.f32 %v1844_v43, %v1484_v57  ;;  %v1859_v2 = vadd.f32 %v1858_v44, %v1485_v58  ;;  %v4277_v14 = vld [vmem:[%s4552_s0 + $0x3c8] sm:$0xff] }
 0x8ca   : > { %v1917_v20 = vmax.f32 %v1819_v17, 0.0  ;;  %v1918_v30 = vmax.f32 %v1833_v26, 0.0  ;;  %v4276_v17 = vld [vmem:[%s4552_s0 + $0x3c0] sm:$0xff] }
 0x8cb   : > { %3114 = vmatpush.bf16.msrb.mxu2 %v4236_v24  ;;  %3128 = vmatpush.bf16.msra.mxu3 %v4244_v25  ;;  %v1903_v15 = vmax.f32 %v1845_v1, 0.0  ;;  %v1904_v16 = vmax.f32 %v1859_v2, 0.0 }
 0x8cc   : > { %v1933_v36 = vpack.c.bf16 %v1917_v20, %v1901_v29  ;;  %v1934_v37 = vpack.c.bf16 %v1918_v30, %v1902_v6 }
 0x8cd   : > { %3136 = vmatpush.bf16.msra.mxu0 %v4258_v18  ;;  %3150 = vmatpush.bf16.msra.mxu1 %v4266_v19 }
 0x8ce   : > { %3115 = vmatmul.bf16.vlgmr.msrb.gmra.mxu2 %v1933_v36  ;;  %3129 = vmatmul.bf16.vlgmr.msra.gmra.mxu3 %v1934_v37 }
 0x8cf   : > { %3163 = vmatpush.bf16.msra.mxu2 %v4275_v27  ;;  %3177 = vmatpush.bf16.msrb.mxu3 %v4283_v28  ;;  %v1872_v49 = vpop.f32.mrf.mxu2  ;;  %v1886_v50 = vpop.f32.mrf.mxu3 }
 0x8d0   : > { %v1846_v22 = vpop.f32.mrf.mxu0  ;;  %v1860_v54 = vpop.f32.mrf.mxu1  ;;  %v1873_v21 = vadd.f32 %v1872_v49, %v1486_v7  ;;  %v1887_v23 = vadd.f32 %v1886_v50, %v1487_v8 }
 0x8d1   : > { %3137 = vmatpush.bf16.msra.mxu0 %v4257_v31  ;;  %3151 = vmatpush.bf16.msra.mxu1 %v4265_v33  ;;  %v1847_v61 = vadd.f32 %v1846_v22, %v1484_v57  ;;  %v1861_v62 = vadd.f32 %v1860_v54, %v1485_v58 }
 0x8d2   : > { %v1905_v28 = vmax.f32 %v1873_v21, 0.0  ;;  %v1906_v29 = vmax.f32 %v1887_v23, 0.0 }
 0x8d3   : > { %3164 = vmatpush.bf16.msra.mxu2 %v4274_v39  ;;  %3178 = vmatpush.bf16.msrb.mxu3 %v4282_v41  ;;  %v1919_v9 = vmax.f32 %v1847_v61, 0.0  ;;  %v1920_v10 = vmax.f32 %v1861_v62, 0.0  ;;  %v4318_v41 = vld [vmem:[%s622_s14] ss:$0 sm:$0xff] }
 0x8d5   : > { %3138 = vmatpush.bf16.msra.mxu0 %v4256_v42  ;;  %3152 = vmatpush.bf16.msra.mxu1 %v4264_v38  ;;  %v1935_v24 = vpack.c.bf16 %v1919_v9, %v1903_v15  ;;  %v1936_v25 = vpack.c.bf16 %v1920_v10, %v1904_v16 }
 0x8d7   : > { %3165 = vmatpush.bf16.msra.mxu2 %v4273_v45  ;;  %3179 = vmatpush.bf16.msrb.mxu3 %v4281_v46  ;;  %v1874_v32 = vpop.f32.mrf.mxu2  ;;  %v1888_v4 = vpop.f32.mrf.mxu3 }
 0x8d8   : > { %v1875_v18 = vadd.f32 %v1874_v32, %v1486_v7  ;;  %v1889_v19 = vadd.f32 %v1888_v4, %v1487_v8 }
 0x8d9   : > { %3139 = vmatpush.bf16.msra.mxu0 %v4255_v47  ;;  %3153 = vmatpush.bf16.msra.mxu1 %v4263_v48 }
 0x8da   : > { %v1921_v26 = vmax.f32 %v1875_v18, 0.0  ;;  %v1922_v27 = vmax.f32 %v1889_v19, 0.0 }
 0x8db   : > { %3166 = vmatpush.bf16.msra.mxu2 %v4272_v51  ;;  %3180 = vmatpush.bf16.msrb.mxu3 %v4280_v52 }
 0x8dc   : > { %v1937_v6 = vpack.c.bf16 %v1921_v26, %v1905_v28  ;;  %v1938_v20 = vpack.c.bf16 %v1922_v27, %v1906_v29 }
 0x8dd   : > { %3140 = vmatpush.bf16.msra.mxu0 %v4254_v40  ;;  %3154 = vmatpush.bf16.msra.mxu1 %v4262_v53 }
 0x8df   : > { %3167 = vmatpush.bf16.msra.mxu2 %v4271_v55  ;;  %3181 = vmatpush.bf16.msrb.mxu3 %v4279_v56 }
 0x8e1   : > { %3141 = vmatpush.bf16.msra.mxu0 %v4253_v59  ;;  %3155 = vmatpush.bf16.msra.mxu1 %v4261_v60 }
 0x8e3   : > { %3168 = vmatpush.bf16.msra.mxu2 %v4270_v63  ;;  %3182 = vmatpush.bf16.msrb.mxu3 %v4278_v0 }
 0x8e5   : > { %3142 = vmatpush.bf16.msra.mxu0 %v4252_v3  ;;  %3156 = vmatpush.bf16.msra.mxu1 %v4260_v5 }
 0x8e7   : > { %3169 = vmatpush.bf16.msra.mxu2 %v4269_v13  ;;  %3183 = vmatpush.bf16.msrb.mxu3 %v4277_v14 }
 0x8e8   : > { %3143 = vmatmul.bf16.vlgmr.msra.gmra.mxu0 %v1935_v24  ;;  %3157 = vmatmul.bf16.vlgmr.msra.gmra.mxu1 %v1936_v25 }
 0x8eb   : > { %3170 = vmatpush.bf16.msra.mxu2 %v4268_v11  ;;  %3184 = vmatpush.bf16.msrb.mxu3 %v4276_v17 }
 0x8ee   : > { %3171 = vmatmul.bf16.vlgmr.msra.gmra.mxu2 %v1937_v6  ;;  %3185 = vmatmul.bf16.vlgmr.msrb.gmra.mxu3 %v1938_v20 }
 0x924   : > { %v2976_v30 = vpop.f32.mrf.mxu0  ;;  %v2990_v31 = vpop.f32.mrf.mxu1 }
 0x925   : > { %v2977_v38 = vadd.f32 %v4318_v41, %v2976_v30 }
 0x927   : > { %v2991_v46 = vadd.f32 %v2990_v31, %v2977_v38 }
 0x92c   : > { %v2978_v33 = vpop.f32.mrf.mxu0  ;;  %v2992_v39 = vpop.f32.mrf.mxu1 }
 0x92d   : > { %v2979_v51 = vadd.f32 %v4318_v41, %v2978_v33 }
 0x92f   : > { %v2993_v40 = vadd.f32 %v2992_v39, %v2979_v51 }
 0x931   : > { %v3004_v36 = vpop.f32.mrf.mxu2  ;;  %v3018_v37 = vpop.f32.mrf.mxu3 }
 0x932   : > { %v3005_v47 = vadd.f32 %v3004_v36, %v2991_v46 }
 0x934   : > { %v3019_v52 = vadd.f32 %v3018_v37, %v3005_v47 }
 0x935   : > { %v3032_v43 = vpop.f32.mrf.mxu0  ;;  %v3046_v45 = vpop.f32.mrf.mxu1 }
 0x936   : > { %v3033_v22 = vadd.f32 %v3032_v43, %v3019_v52 }
 0x938   : > { %v3047_v58 = vadd.f32 %v3046_v45, %v3033_v22 }
 0x939   : > { %v3006_v44 = vpop.f32.mrf.mxu2  ;;  %v3020_v42 = vpop.f32.mrf.mxu3 }
 0x93a   : > { %v3007_v54 = vadd.f32 %v3006_v44, %v2993_v40 }
 0x93c   : > { %v3021_v59 = vadd.f32 %v3020_v42, %v3007_v54 }
 0x93d   : > { %v3034_v48 = vpop.f32.mrf.mxu0  ;;  %v3048_v53 = vpop.f32.mrf.mxu1 }
 0x93e   : > { %v3035_v61 = vadd.f32 %v3034_v48, %v3021_v59 }
 0x940   : > { %v3049_v0 = vadd.f32 %v3048_v53, %v3035_v61 }
 0x941   : > { %v3060_v49 = vpop.f32.mrf.mxu2  ;;  %v3074_v50 = vpop.f32.mrf.mxu3 }
 0x942   : > { %v3061_v60 = vadd.f32 %v3060_v49, %v3047_v58 }
 0x944   : > { %v3075_v63 = vadd.f32 %v3074_v50, %v3061_v60 }
 0x945   : > { %v3088_v55 = vpop.f32.mrf.mxu0  ;;  %v3102_v62 = vpop.f32.mrf.mxu1 }
 0x946   : > { %v3089_v4 = vadd.f32 %v3088_v55, %v3075_v63 }
 0x948   : > { %v3103_v5 = vadd.f32 %v3102_v62, %v3089_v4  ;;  %v4319_v62 = vld [vmem:[%s625_s19] ss:$0 sm:$0xff]  ;;  %s4416_s19 = smov [#allocation2]  }
 0x949   : > { %v3062_v56 = vpop.f32.mrf.mxu2  ;;  %v3076_v57 = vpop.f32.mrf.mxu3  ;;  %s3256_s20 = sshll.u32 %s4416_s19, 4  ;;  %s3257_s20 = int_to_ptr.vmem [resolvable:$true] %s3256_s20 }
 0x94a   : > { %v3063_v3 = vadd.f32 %v3062_v56, %v3049_v0  ;;  %v4320_v0 = vld [vmem:[%s628_s23] ss:$0 sm:$0xff]  ;;  %s3258_s23 = sshll.u32 %s5072_s15, 4  ;;  %s3259_s23 = int_to_ptr.hbm [resolvable:$true] %s3258_s23 }
 0x94c   : > { %v3077_v7 = vadd.f32 %v3076_v57, %v3063_v3 }
 0x94d   : > { %v3090_v1 = vpop.f32.mrf.mxu0  ;;  %v3104_v8 = vpop.f32.mrf.mxu1 }
 0x94e   : > { %v3091_v13 = vadd.f32 %v3090_v1, %v3077_v7 }
 0x950   : > { %v3105_v18 = vadd.f32 %v3104_v8, %v3091_v13 }
 0x951   : > { %v3116_v2 = vpop.f32.mrf.mxu2  ;;  %v3130_v32 = vpop.f32.mrf.mxu3 }
 0x952   : > { %v3117_v9 = vadd.f32 %v3116_v2, %v3103_v5 }
 0x954   : > { %v3131_v16 = vadd.f32 %v3130_v32, %v3117_v9 }
 0x959   : > { %v3118_v14 = vpop.f32.mrf.mxu2  ;;  %v3132_v15 = vpop.f32.mrf.mxu3 }
 0x95a   : > { %v3119_v23 = vadd.f32 %v3118_v14, %v3105_v18 }
 0x95c   : > { %v3133_v26 = vadd.f32 %v3132_v15, %v3119_v23 }
 0x965   : > { %v3144_v10 = vpop.f32.mrf.mxu0  ;;  %v3158_v21 = vpop.f32.mrf.mxu1 }
 0x966   : > { %v3145_v19 = vadd.f32 %v3144_v10, %v3131_v16 }
 0x968   : > { %v3159_v24 = vadd.f32 %v3158_v21, %v3145_v19 }
 0x96d   : > { %v3146_v25 = vpop.f32.mrf.mxu0  ;;  %v3160_v20 = vpop.f32.mrf.mxu1 }
 0x96e   : > { %v3147_v28 = vadd.f32 %v3146_v25, %v3133_v26 }
 0x970   : > { %v3161_v30 = vadd.f32 %v3160_v20, %v3147_v28 }
 0x971   : > { %v3172_v11 = vpop.f32.mrf.mxu2  ;;  %v3186_v17 = vpop.f32.mrf.mxu3 }
 0x972   : > { %v3173_v27 = vadd.f32 %v3172_v11, %v3159_v24 }
 0x974   : > { %v3187_v29 = vadd.f32 %v3186_v17, %v3173_v27 }
 0x976   : > { %v3191_v6 = vadd.f32 %v3187_v29, %v4790_v34 }
 0x978   : > { %v3195_v31 = vsel %vm677_vm1, %v3191_v6, 0.0 }
 0x979   : > { %v3174_v33 = vpop.f32.mrf.mxu2  ;;  %3196 = vadd.xlane.f32.xlu1 %v3195_v31  ;;  %v3188_v37 = vpop.f32.mrf.mxu3 }
 0x97a   : > { %v3175_v36 = vadd.f32 %v3174_v33, %v3161_v30 }
 0x97c   : > { %v3189_v39 = vadd.f32 %v3188_v37, %v3175_v36 }
 0x97e   : > { %v3192_v41 = vadd.f32 %v3189_v39, %v4792_v35 }
 0x980   : > { %v3198_v43 = vsel %vm677_vm1, %v3192_v41, 0.0 }
 0x981   : > { %3199 = vadd.xlane.f32.xlu1 %v3198_v43 }
 0x9ec   : > { %v3197_v44 = vpop.xlane.xlu1 %3196 }
 0x9ed   : > { %v3201_v42 = vmul.f32 %v3197_v44, %v4720_v12 }
 0x9ef   : > { %v3203_v38 = vsub.f32 %v3191_v6, %v3201_v42 }
 0x9f1   : > { %v3205_v45 = vmul.f32 %v3203_v38, %v3203_v38 }
 0x9f3   : > { %v3207_v34 = vsel %vm677_vm1, %v3205_v45, 0.0 }
 0x9f4   : > { %3208 = vadd.xlane.f32.xlu1 %v3207_v34  ;;  %v3200_v46 = vpop.xlane.xlu1 %3199 }
 0x9f5   : > { %v3202_v47 = vmul.f32 %v3200_v46, %v4720_v12 }
 0x9f7   : > { %v3204_v48 = vsub.f32 %v3192_v41, %v3202_v47 }
 0x9f9   : > { %v3206_v49 = vmul.f32 %v3204_v48, %v3204_v48 }
 0x9fb   : > { %v3210_v50 = vsel %vm677_vm1, %v3206_v49, 0.0 }
 0x9fc   : > { %3211 = vadd.xlane.f32.xlu1 %v3210_v50 }
 0xa67   : > { %v3209_v35 = vpop.xlane.xlu1 %3208 }
 0xa68   : > { %v3213_v51 = vmul.f32 %v3209_v35, %v4720_v12 }
 0xa6a   : > { %v3215_v52 = vadd.f32 1e-05, %v3213_v51 }
 0xa6c   : > { %4359 = vrsqrt.f32 %v3215_v52  ;;  %vm3223_vm4 = vweird.f32 %v3215_v52 }
 0xa6f   : > { %v3212_v40 = vpop.xlane.xlu1 %3211 }
 0xa70   : > { %v3214_v53 = vmul.f32 %v3212_v40, %v4720_v12 }
 0xa72   : > { %v4360_v22 = vpop.eup %4359  ;;  %v3216_v54 = vadd.f32 1e-05, %v3214_v53 }
 0xa73   : > { %v3218_v55 = vmul.f32 %v4360_v22, %v3215_v52  ;;  %vm3224_vm0 = vweird.f32 %v4360_v22 }
 0xa74   : > { %4361 = vrsqrt.f32 %v3216_v54  ;;  %vm3225_vm5 = vmor %vm3223_vm4, %vm3224_vm0  ;;  %vm3233_vm7 = vweird.f32 %v3216_v54 }
 0xa75   : > { %v3219_v56 = vmul.f32 %v4360_v22, %v3218_v55 }
 0xa77   : > { %v3220_v57 = vmul.f32 0.5, %v3219_v56 }
 0xa79   : > { %v3221_v58 = vsub.f32 1.5, %v3220_v57 }
 0xa7a   : > { %v4362_v59 = vpop.eup %4361 }
 0xa7b   : > { %v3222_v60 = vmul.f32 %v4360_v22, %v3221_v58  ;;  %v3228_v61 = vmul.f32 %v4362_v59, %v3216_v54  ;;  %vm3234_vm6 = vweird.f32 %v4362_v59 }
 0xa7c   : > { %vm3235_vm8 = vmor %vm3233_vm7, %vm3234_vm6 }
 0xa7d   : > { %v3226_v12 = vsel %vm3225_vm5, %v4360_v22, %v3222_v60  ;;  %v3229_v63 = vmul.f32 %v4362_v59, %v3228_v61 }
 0xa7e   : > { %v3237_v1 = vmul.f32 %v3226_v12, %v3203_v38 }
 0xa7f   : > { %v3230_v2 = vmul.f32 0.5, %v3229_v63 }
 0xa80   : > { %v3242_v32 = vmul.f32 %v4319_v62, %v3237_v1 }
 0xa81   : > { %v3231_v4 = vsub.f32 1.5, %v3230_v2 }
 0xa82   : > { %v3247_v3 = vadd.f32 %v4320_v0, %v3242_v32 }
 0xa83   : > { %v3232_v5 = vmul.f32 %v4362_v59, %v3231_v4 }
 0xa84   : > { %3249 = vst.msk [vmem:[#allocation2] sm:$0xff] %vm677_vm1, %v3247_v3 }
 0xa85   : > { %v3236_v7 = vsel %vm3235_vm8, %v4362_v59, %v3232_v5 }
 0xa86   : > { %v3238_v8 = vmul.f32 %v3236_v7, %v3204_v48 }
 0xa88   : > { %v3243_v9 = vmul.f32 %v4319_v62, %v3238_v8 }
 0xa8a   : > { %v3248_v10 = vadd.f32 %v4320_v0, %v3243_v9 }
 0xa8c   : > { %3250 = vst.msk [vmem:[#allocation2 + $0x8] sm:$0xff] %vm677_vm1, %v3248_v10 }
 0xa8d   : > { %4285 = dma.vmem_to_hbm [thread:$0]  (%p4288_p5), %s3257_s20, 256, %s3259_s23, [#allocation3], %s4417_s24, %s4417_s24, %s4418_s25  }
 0xa8e   : > { %4396 = dma.done.wait (%p4288_p5), [#allocation3], 256  }
 0xa8f   : > { %4398 = vsyncadd (%p4288_p5), [#allocation3], 4294967040 }
 0xa90 PF: > { %s5073_s27 = sld [smem:[#allocation5_spill]] }
 0xa96   : > { %s25_s29 = sadd.s32 1, %s5073_s27  }
 0xa97   : > { %p22_p6 = scmp.ge.s32.totalorder %s25_s29, 7  }
 0xa99   :  { %24 = sbr.rel (!%p22_p6) target bundleno = 7 (0x7), region = 143 }
 0xa9e   :  { %3275 = vsyncpa [#allocation3], 1 }
 0xa9f   :  { %3277 = vsyncpa [#allocation3 + $0x1], 1 }

</bundles_post_ra>
